<compile_context>
chip_gen: v6e
topology: v6e:2x2x1
jax: 0.10.0
libtpu: 0.0.40
codegen_flags: <defaults>
</compile_context>

<pallas_src>
import functools

import jax
import jax.numpy as jnp
import numpy as np
from jax.experimental import pallas as pl
from jax.experimental.pallas import tpu as pltpu

H_IN = W_IN = 14       # spatial size the architecture requires (fc1 expects 256*1*1)
KIN = 5 * W_IN         # 70: the 5 image rows each pool-row needs, flattened
NOFF = 768             # conv1 output lanes per pool-row offset (3 cols * 2 chunks * 128)
NC1 = 3 * NOFF         # 2304: conv1 output lanes for all 3 row offsets


def _round_up(x, m):
    return (x + m - 1) // m * m


# ------------------------------ fused kernel --------------------------------

def _net1_kernel(xr_ref, a_ref, b1_ref, w2_ref, b2_ref, w3_ref, b3_ref,
                 wf1_ref, bf1_ref, wf2_ref, bf2_ref, out_ref):
    f32, bf16 = jnp.float32, jnp.bfloat16

    # conv1: one MXU push covers all 3 pool-row offsets and all 12 output cols.
    #   xr_ref[p*TB + t, s*14 + w] = x[t, 3p + s, w]                      (bf16)
    #   a_ref[s*14 + w, i*768 + jr*256 + pg*128 + half*64 + c]
    #     = conv1_w[c, 0, s - i, (w) - (3*(pg + 2*half) + jr)]   (banded, bf16)
    z = jnp.dot(xr_ref[...], a_ref[...], preferred_element_type=f32)  # (4TB, 2304)

    # 3x3 / stride-3 max pool, fused into the packed lane layout:
    # max over the 3 row offsets, then over the 3 columns (jr) of each window.
    rmax = jnp.maximum(jnp.maximum(z[:, 0:NOFF], z[:, NOFF:2 * NOFF]),
                       z[:, 2 * NOFF:3 * NOFF])                       # (4TB, 768)
    pooled = jnp.maximum(jnp.maximum(rmax[:, 0:256], rmax[:, 256:512]),
                         rmax[:, 512:768])                            # (4TB, 256)
    pooled = jnp.maximum(pooled + b1_ref[...], 0.0).astype(bf16)      # bias + ReLU

    # conv2: contract over the 4 pool rows p (contiguous TB-row slices) and the
    # 256 densely packed (window, channel) features of each row.
    tb = pooled.shape[0] // 4
    h = jnp.dot(pooled[0:tb], w2_ref[0], preferred_element_type=f32)
    for p in range(1, 4):
        h = h + jnp.dot(pooled[p * tb:(p + 1) * tb], w2_ref[p],
                        preferred_element_type=f32)
    h = jnp.maximum(h + b2_ref[...], 0.0).astype(bf16)                # (TB, 512)

    # conv3: its 2x2 kernel covers the whole 2x2 map -> a plain matmul, + ReLU
    h = jnp.maximum(jnp.dot(h, w3_ref[...], preferred_element_type=f32)
                    + b3_ref[...], 0.0).astype(bf16)                  # (TB, 256)
    # fc1 + ReLU, fc2 (both lane-padded to 128 columns)
    h = jnp.maximum(jnp.dot(h, wf1_ref[...], preferred_element_type=f32)
                    + bf1_ref[...], 0.0).astype(bf16)                 # (TB, HP)
    out = jnp.dot(h, wf2_ref[...], preferred_element_type=f32) + bf2_ref[...]
    out_ref[...] = out.astype(out_ref.dtype)


# -------------------------- one-time weight packing --------------------------

def pack_params(params, nb_hidden, nb_output):
    """Pack PyTorch-layout weights into MXU-friendly, densely packed matrices."""
    w1 = np.asarray(params["conv1_w"], np.float32)   # (64, 1, 3, 3)
    b1 = np.asarray(params["conv1_b"], np.float32)
    w2 = np.asarray(params["conv2_w"], np.float32)   # (128, 64, 3, 3)
    b2 = np.asarray(params["conv2_b"], np.float32)
    w3 = np.asarray(params["conv3_w"], np.float32)   # (256, 128, 2, 2)
    b3 = np.asarray(params["conv3_b"], np.float32)
    fw1 = np.asarray(params["fc1_w"], np.float32)    # (nb_hidden, 256)
    fb1 = np.asarray(params["fc1_b"], np.float32)
    fw2 = np.asarray(params["fc2_w"], np.float32)    # (nb_output, nb_hidden)
    fb2 = np.asarray(params["fc2_b"], np.float32)
    c1 = w1.shape[0]          # 64
    c2 = w2.shape[0]          # 128
    c3 = w3.shape[0]          # 256

    # conv1 as one banded matrix.  Output lane layout (per pool-row offset i):
    #   lane = i*768 + jr*256 + pg*128 + half*64 + c
    # where the conv output column is j = 3*q + jr with q = pg + 2*half.  This
    # makes the pool's column-max a max over three 256-lane slabs and packs both
    # 64-channel pool windows q and q+2 into one 128-lane chunk (no dead lanes).
    A = np.zeros((KIN, NC1), np.float32)
    for i in range(3):                        # row offset inside the pool window
        for di in range(3):                   # conv1 kernel row
            s = i + di                        # local image row (0..4)
            for j in range(12):               # conv1 output column
                q, jr = j // 3, j % 3
                pg, half = q % 2, q // 2
                col = i * NOFF + jr * 256 + pg * 128 + half * 64
                for dw in range(3):           # conv1 kernel column
                    A[s * W_IN + j + dw, col:col + c1] = w1[:, 0, di, dw]
    b1p = np.zeros((1, 256), np.float32)
    for k in range(4):
        b1p[0, k * 64:k * 64 + c1] = b1

    # conv2 as 4 per-pool-row matrices over the packed pooled features.
    W2 = np.zeros((4, 256, 4 * c2), np.float32)
    for oi in range(2):
        for oj in range(2):
            for di in range(3):
                for dj in range(3):
                    p, q = oi + di, oj + dj
                    pg, half = q % 2, q // 2
                    r0 = pg * 128 + half * 64
                    c0 = (oi * 2 + oj) * c2
                    W2[p, r0:r0 + c1, c0:c0 + c2] = w2[:, :, di, dj].T
    b2t = np.tile(b2, 4)[None, :]                             # (1, 512)

    # conv3 covers the whole 2x2 map -> ordinary (512, 256) matrix
    W3 = np.zeros((4 * c2, c3), np.float32)
    for oi in range(2):
        for oj in range(2):
            W3[(oi * 2 + oj) * c2:(oi * 2 + oj + 1) * c2, :] = w3[:, :, oi, oj].T
    b3r = b3[None, :]                                         # (1, 256)

    HP = _round_up(nb_hidden, 128)
    OP = _round_up(nb_output, 128)
    Wf1 = np.zeros((c3, HP), np.float32); Wf1[:, :nb_hidden] = fw1.T
    bf1 = np.zeros((1, HP), np.float32);  bf1[0, :nb_hidden] = fb1
    Wf2 = np.zeros((HP, OP), np.float32); Wf2[:nb_hidden, :nb_output] = fw2.T
    bf2 = np.zeros((1, OP), np.float32);  bf2[0, :nb_output] = fb2

    bf16 = jnp.bfloat16
    return dict(A=jnp.asarray(A, bf16), b1=jnp.asarray(b1p),
                W2=jnp.asarray(W2, bf16), b2=jnp.asarray(b2t),
                W3=jnp.asarray(W3, bf16), b3=jnp.asarray(b3r),
                Wf1=jnp.asarray(Wf1, bf16), bf1=jnp.asarray(bf1),
                Wf2=jnp.asarray(Wf2, bf16), bf2=jnp.asarray(bf2))


# --------------------------------- forward ----------------------------------

def net1_forward(packed, x_nchw, nb_output):
    N, C, H, W = x_nchw.shape
    assert H == H_IN and W == W_IN, "Net1 requires 14x14 inputs"

    # x.view(-1, 1, H, W): every input channel becomes its own image.
    x = x_nchw.reshape(-1, H, W)                      # (B2, 14, 14)
    B2 = x.shape[0]

    # Block size: fill the MXU (TB up to 128) at large batch, but keep >= 2
    # grid blocks whenever possible so both v7x TensorCores get work.
    if B2 >= 256:
        TB = 128
    elif B2 >= 16:
        TB = _round_up((B2 + 1) // 2, 8)
    else:
        TB = max(8, _round_up(B2, 8))
    B2p = _round_up(B2, TB)
    nb = B2p // TB
    x = jnp.pad(x, ((0, B2p - B2), (0, 0), (0, 0)))

    # Per pool-row p, the 5 image rows 3p..3p+4 it needs, flattened to 70 lanes.
    # Rows are laid out (block, pool-row, image) so the kernel does whole-block
    # loads, one big conv1 matmul and contiguous TB-row slices for conv2.
    xs = jnp.stack([x[:, 3 * p:3 * p + 5, :].reshape(B2p, KIN) for p in range(4)],
                   axis=0)                                    # (4, B2p, 70)
    xr = (xs.reshape(4, nb, TB, KIN).transpose(1, 0, 2, 3)
            .reshape(nb * 4 * TB, KIN).astype(jnp.bfloat16))

    HP = packed["Wf1"].shape[1]
    OP = packed["Wf2"].shape[1]

    out = pl.pallas_call(
        _net1_kernel,
        out_shape=jax.ShapeDtypeStruct((B2p, OP), jnp.float32),
        grid=(nb,),
        in_specs=[
            pl.BlockSpec((4 * TB, KIN), lambda n: (n, 0)),      # image rows
            pl.BlockSpec((KIN, NC1), lambda n: (0, 0)),         # conv1 banded
            pl.BlockSpec((1, 256), lambda n: (0, 0)),           # conv1 bias
            pl.BlockSpec((4, 256, 512), lambda n: (0, 0, 0)),   # conv2 (per p)
            pl.BlockSpec((1, 512), lambda n: (0, 0)),
            pl.BlockSpec((512, 256), lambda n: (0, 0)),         # conv3
            pl.BlockSpec((1, 256), lambda n: (0, 0)),
            pl.BlockSpec((256, HP), lambda n: (0, 0)),          # fc1
            pl.BlockSpec((1, HP), lambda n: (0, 0)),
            pl.BlockSpec((HP, OP), lambda n: (0, 0)),           # fc2
            pl.BlockSpec((1, OP), lambda n: (0, 0)),
        ],
        out_specs=pl.BlockSpec((TB, OP), lambda n: (n, 0)),
        compiler_params=pltpu.CompilerParams(
            dimension_semantics=("parallel",),
            vmem_limit_bytes=32 * 1024 * 1024),
    )(xr, packed["A"], packed["b1"], packed["W2"], packed["b2"],
      packed["W3"], packed["b3"], packed["Wf1"], packed["bf1"],
      packed["Wf2"], packed["bf2"])

    # drop padded rows / padded lanes, then x.view(-1, 2, nb_output)
    return out[:B2, :nb_output].reshape(-1, 2, nb_output)


# --------------------------- pure-JAX reference ------------------------------

def net1_reference(params, x_nchw, nb_output):
    x = x_nchw.reshape(-1, 1, x_nchw.shape[2], x_nchw.shape[3])

    def conv(x, w, b):
        y = jax.lax.conv_general_dilated(
            x, w, window_strides=(1, 1), padding="VALID",
            dimension_numbers=("NCHW", "OIHW", "NCHW"))
        return y + b.reshape(1, -1, 1, 1)

    x = conv(x, params["conv1_w"], params["conv1_b"])
    x = jax.lax.reduce_window(x, -jnp.inf, jax.lax.max,
                              (1, 1, 3, 3), (1, 1, 3, 3), "VALID")
    x = jax.nn.relu(x)
    x = jax.nn.relu(conv(x, params["conv2_w"], params["conv2_b"]))
    x = jax.nn.relu(conv(x, params["conv3_w"], params["conv3_b"]))
    x = x.reshape(x.shape[0], -1)
    x = jax.nn.relu(x @ params["fc1_w"].T + params["fc1_b"])
    x = x @ params["fc2_w"].T + params["fc2_b"]
    return x.reshape(-1, 2, nb_output)


# ----------------------------------- main ------------------------------------

if __name__ == "__main__":
    nb_hidden, nb_output = 32, 10
    key = jax.random.PRNGKey(0)
    ks = jax.random.split(key, 11)

    def init(k, shape, scale=0.05):
        return jax.random.normal(k, shape, dtype=jnp.float32) * scale

    params = {
        "conv1_w": init(ks[0], (64, 1, 3, 3)),
        "conv1_b": init(ks[1], (64,)),
        "conv2_w": init(ks[2], (128, 64, 3, 3)),
        "conv2_b": init(ks[3], (128,)),
        "conv3_w": init(ks[4], (256, 128, 2, 2)),
        "conv3_b": init(ks[5], (256,)),
        "fc1_w": init(ks[6], (nb_hidden, 256)),
        "fc1_b": init(ks[7], (nb_hidden,)),
        "fc2_w": init(ks[8], (nb_output, nb_hidden)),
        "fc2_b": init(ks[9], (nb_output,)),
    }

    # NCHW input, as the PyTorch module expects: (batch, 2, 14, 14)
    x = jax.random.normal(ks[10], (2, 2, 14, 14), dtype=jnp.float32)

    # one-time weight packing (numpy, outside jit), then a fully-jitted forward
    packed = pack_params(params, nb_hidden, nb_output)
    fwd = jax.jit(functools.partial(net1_forward, nb_output=nb_output))

    out = jax.block_until_ready(fwd(packed, x))
    assert out.shape == (2, 2, nb_output), out.shape

    ref = jax.block_until_ready(net1_reference(params, x, nb_output))
    assert np.allclose(np.asarray(out), np.asarray(ref), atol=1e-2, rtol=1e-2)

    print("KERNEL_OK")
</pallas_src>

<mosaic_0001>
module attributes {stable_mosaic.version = 11 : i64} {
  func.func @_net1_kernel(%arg0: i32, %arg1: memref<32x70xbf16, #tpu.memory_space<vmem>>, %arg2: memref<70x2304xbf16, #tpu.memory_space<vmem>>, %arg3: memref<1x256xf32, #tpu.memory_space<vmem>>, %arg4: memref<4x256x512xbf16, #tpu.memory_space<vmem>>, %arg5: memref<1x512xf32, #tpu.memory_space<vmem>>, %arg6: memref<512x256xbf16, #tpu.memory_space<vmem>>, %arg7: memref<1x256xf32, #tpu.memory_space<vmem>>, %arg8: memref<256x128xbf16, #tpu.memory_space<vmem>>, %arg9: memref<1x128xf32, #tpu.memory_space<vmem>>, %arg10: memref<128x128xbf16, #tpu.memory_space<vmem>>, %arg11: memref<1x128xf32, #tpu.memory_space<vmem>>, %arg12: memref<8x128xf32, #tpu.memory_space<vmem>>) attributes {dimension_semantics = [#tpu.dimension_semantics<parallel>], iteration_bounds = array<i64: 1>, scalar_prefetch = 0 : i64, scratch_operands = 0 : i64, tpu.core_type = #tpu.core_type<tc>, window_params = [{transform_indices = @transform_0, window_bounds = array<i64: 32, 70>}, {pipeline_mode = #tpu.pipeline_mode<synchronous>, transform_indices = @transform_1, window_bounds = array<i64: 70, 2304>}, {pipeline_mode = #tpu.pipeline_mode<synchronous>, transform_indices = @transform_2, window_bounds = array<i64: 1, 256>}, {pipeline_mode = #tpu.pipeline_mode<synchronous>, transform_indices = @transform_3, window_bounds = array<i64: 4, 256, 512>}, {pipeline_mode = #tpu.pipeline_mode<synchronous>, transform_indices = @transform_4, window_bounds = array<i64: 1, 512>}, {pipeline_mode = #tpu.pipeline_mode<synchronous>, transform_indices = @transform_5, window_bounds = array<i64: 512, 256>}, {pipeline_mode = #tpu.pipeline_mode<synchronous>, transform_indices = @transform_6, window_bounds = array<i64: 1, 256>}, {pipeline_mode = #tpu.pipeline_mode<synchronous>, transform_indices = @transform_7, window_bounds = array<i64: 256, 128>}, {pipeline_mode = #tpu.pipeline_mode<synchronous>, transform_indices = @transform_8, window_bounds = array<i64: 1, 128>}, {pipeline_mode = #tpu.pipeline_mode<synchronous>, transform_indices = @transform_9, window_bounds = array<i64: 128, 128>}, {pipeline_mode = #tpu.pipeline_mode<synchronous>, transform_indices = @transform_10, window_bounds = array<i64: 1, 128>}, {transform_indices = @transform_11, window_bounds = array<i64: 8, 128>}]} {
    %c0 = arith.constant 0 : index
    %c0_0 = arith.constant 0 : index
    %0 = vector.load %arg1[%c0, %c0_0] : memref<32x70xbf16, #tpu.memory_space<vmem>>, vector<32x70xbf16>
    %c0_1 = arith.constant 0 : index
    %c0_2 = arith.constant 0 : index
    %1 = vector.load %arg2[%c0_1, %c0_2] : memref<70x2304xbf16, #tpu.memory_space<vmem>>, vector<70x2304xbf16>
    %cst = arith.constant dense<0.000000e+00> : vector<32x2304xf32>
    %2 = tpu.matmul %0, %1, %cst {dimension_numbers = #tpu.dot_dimension_numbers<[1], [0], [0], [1], [0, 0, 1, 1], [], []>} : vector<32x70xbf16>, vector<70x2304xbf16>, vector<32x2304xf32> -> vector<32x2304xf32>
    %3 = vector.extract_strided_slice %2 {offsets = [0, 0], sizes = [32, 768], strides = [1, 1]} : vector<32x2304xf32> to vector<32x768xf32>
    %4 = vector.extract_strided_slice %2 {offsets = [0, 768], sizes = [32, 768], strides = [1, 1]} : vector<32x2304xf32> to vector<32x768xf32>
    %5 = arith.maximumf %3, %4 : vector<32x768xf32>
    %6 = vector.extract_strided_slice %2 {offsets = [0, 1536], sizes = [32, 768], strides = [1, 1]} : vector<32x2304xf32> to vector<32x768xf32>
    %7 = arith.maximumf %5, %6 : vector<32x768xf32>
    %8 = vector.extract_strided_slice %7 {offsets = [0, 0], sizes = [32, 256], strides = [1, 1]} : vector<32x768xf32> to vector<32x256xf32>
    %9 = vector.extract_strided_slice %7 {offsets = [0, 256], sizes = [32, 256], strides = [1, 1]} : vector<32x768xf32> to vector<32x256xf32>
    %10 = arith.maximumf %8, %9 : vector<32x256xf32>
    %11 = vector.extract_strided_slice %7 {offsets = [0, 512], sizes = [32, 256], strides = [1, 1]} : vector<32x768xf32> to vector<32x256xf32>
    %12 = arith.maximumf %10, %11 : vector<32x256xf32>
    %c0_3 = arith.constant 0 : index
    %c0_4 = arith.constant 0 : index
    %13 = vector.load %arg3[%c0_3, %c0_4] : memref<1x256xf32, #tpu.memory_space<vmem>>, vector<1x256xf32>
    %14 = vector.broadcast %13 : vector<1x256xf32> to vector<32x256xf32>
    %15 = arith.addf %12, %14 : vector<32x256xf32>
    %cst_5 = arith.constant 0.000000e+00 : f32
    %16 = vector.broadcast %cst_5 : f32 to vector<32x256xf32>
    %17 = arith.maximumf %15, %16 : vector<32x256xf32>
    %18 = arith.truncf %17 : vector<32x256xf32> to vector<32x256xbf16>
    %19 = vector.extract_strided_slice %18 {offsets = [0, 0], sizes = [8, 256], strides = [1, 1]} : vector<32x256xbf16> to vector<8x256xbf16>
    %c0_6 = arith.constant 0 : index
    %c0_7 = arith.constant 0 : index
    %c0_8 = arith.constant 0 : index
    %20 = vector.load %arg4[%c0_6, %c0_7, %c0_8] : memref<4x256x512xbf16, #tpu.memory_space<vmem>>, vector<1x256x512xbf16>
    %21 = vector.shape_cast %20 : vector<1x256x512xbf16> to vector<256x512xbf16>
    %cst_9 = arith.constant dense<0.000000e+00> : vector<8x512xf32>
    %22 = tpu.matmul %19, %21, %cst_9 {dimension_numbers = #tpu.dot_dimension_numbers<[1], [0], [0], [1], [0, 0, 1, 1], [], []>} : vector<8x256xbf16>, vector<256x512xbf16>, vector<8x512xf32> -> vector<8x512xf32>
    %23 = vector.extract_strided_slice %18 {offsets = [8, 0], sizes = [8, 256], strides = [1, 1]} : vector<32x256xbf16> to vector<8x256xbf16>
    %c1 = arith.constant 1 : index
    %c0_10 = arith.constant 0 : index
    %c0_11 = arith.constant 0 : index
    %24 = vector.load %arg4[%c1, %c0_10, %c0_11] : memref<4x256x512xbf16, #tpu.memory_space<vmem>>, vector<1x256x512xbf16>
    %25 = vector.shape_cast %24 : vector<1x256x512xbf16> to vector<256x512xbf16>
    %cst_12 = arith.constant dense<0.000000e+00> : vector<8x512xf32>
    %26 = tpu.matmul %23, %25, %cst_12 {dimension_numbers = #tpu.dot_dimension_numbers<[1], [0], [0], [1], [0, 0, 1, 1], [], []>} : vector<8x256xbf16>, vector<256x512xbf16>, vector<8x512xf32> -> vector<8x512xf32>
    %27 = arith.addf %22, %26 : vector<8x512xf32>
    %28 = vector.extract_strided_slice %18 {offsets = [16, 0], sizes = [8, 256], strides = [1, 1]} : vector<32x256xbf16> to vector<8x256xbf16>
    %c2 = arith.constant 2 : index
    %c0_13 = arith.constant 0 : index
    %c0_14 = arith.constant 0 : index
    %29 = vector.load %arg4[%c2, %c0_13, %c0_14] : memref<4x256x512xbf16, #tpu.memory_space<vmem>>, vector<1x256x512xbf16>
    %30 = vector.shape_cast %29 : vector<1x256x512xbf16> to vector<256x512xbf16>
    %cst_15 = arith.constant dense<0.000000e+00> : vector<8x512xf32>
    %31 = tpu.matmul %28, %30, %cst_15 {dimension_numbers = #tpu.dot_dimension_numbers<[1], [0], [0], [1], [0, 0, 1, 1], [], []>} : vector<8x256xbf16>, vector<256x512xbf16>, vector<8x512xf32> -> vector<8x512xf32>
    %32 = arith.addf %27, %31 : vector<8x512xf32>
    %33 = vector.extract_strided_slice %18 {offsets = [24, 0], sizes = [8, 256], strides = [1, 1]} : vector<32x256xbf16> to vector<8x256xbf16>
    %c3 = arith.constant 3 : index
    %c0_16 = arith.constant 0 : index
    %c0_17 = arith.constant 0 : index
    %34 = vector.load %arg4[%c3, %c0_16, %c0_17] : memref<4x256x512xbf16, #tpu.memory_space<vmem>>, vector<1x256x512xbf16>
    %35 = vector.shape_cast %34 : vector<1x256x512xbf16> to vector<256x512xbf16>
    %cst_18 = arith.constant dense<0.000000e+00> : vector<8x512xf32>
    %36 = tpu.matmul %33, %35, %cst_18 {dimension_numbers = #tpu.dot_dimension_numbers<[1], [0], [0], [1], [0, 0, 1, 1], [], []>} : vector<8x256xbf16>, vector<256x512xbf16>, vector<8x512xf32> -> vector<8x512xf32>
    %37 = arith.addf %32, %36 : vector<8x512xf32>
    %c0_19 = arith.constant 0 : index
    %c0_20 = arith.constant 0 : index
    %38 = vector.load %arg5[%c0_19, %c0_20] : memref<1x512xf32, #tpu.memory_space<vmem>>, vector<1x512xf32>
    %39 = vector.broadcast %38 : vector<1x512xf32> to vector<8x512xf32>
    %40 = arith.addf %37, %39 : vector<8x512xf32>
    %cst_21 = arith.constant 0.000000e+00 : f32
    %41 = vector.broadcast %cst_21 : f32 to vector<8x512xf32>
    %42 = arith.maximumf %40, %41 : vector<8x512xf32>
    %43 = arith.truncf %42 : vector<8x512xf32> to vector<8x512xbf16>
    %c0_22 = arith.constant 0 : index
    %c0_23 = arith.constant 0 : index
    %44 = vector.load %arg6[%c0_22, %c0_23] : memref<512x256xbf16, #tpu.memory_space<vmem>>, vector<512x256xbf16>
    %cst_24 = arith.constant dense<0.000000e+00> : vector<8x256xf32>
    %45 = tpu.matmul %43, %44, %cst_24 {dimension_numbers = #tpu.dot_dimension_numbers<[1], [0], [0], [1], [0, 0, 1, 1], [], []>} : vector<8x512xbf16>, vector<512x256xbf16>, vector<8x256xf32> -> vector<8x256xf32>
    %c0_25 = arith.constant 0 : index
    %c0_26 = arith.constant 0 : index
    %46 = vector.load %arg7[%c0_25, %c0_26] : memref<1x256xf32, #tpu.memory_space<vmem>>, vector<1x256xf32>
    %47 = vector.broadcast %46 : vector<1x256xf32> to vector<8x256xf32>
    %48 = arith.addf %45, %47 : vector<8x256xf32>
    %cst_27 = arith.constant 0.000000e+00 : f32
    %49 = vector.broadcast %cst_27 : f32 to vector<8x256xf32>
    %50 = arith.maximumf %48, %49 : vector<8x256xf32>
    %51 = arith.truncf %50 : vector<8x256xf32> to vector<8x256xbf16>
    %c0_28 = arith.constant 0 : index
    %c0_29 = arith.constant 0 : index
    %52 = vector.load %arg8[%c0_28, %c0_29] : memref<256x128xbf16, #tpu.memory_space<vmem>>, vector<256x128xbf16>
    %cst_30 = arith.constant dense<0.000000e+00> : vector<8x128xf32>
    %53 = tpu.matmul %51, %52, %cst_30 {dimension_numbers = #tpu.dot_dimension_numbers<[1], [0], [0], [1], [0, 0, 1, 1], [], []>} : vector<8x256xbf16>, vector<256x128xbf16>, vector<8x128xf32> -> vector<8x128xf32>
    %c0_31 = arith.constant 0 : index
    %c0_32 = arith.constant 0 : index
    %54 = vector.load %arg9[%c0_31, %c0_32] : memref<1x128xf32, #tpu.memory_space<vmem>>, vector<1x128xf32>
    %55 = vector.broadcast %54 : vector<1x128xf32> to vector<8x128xf32>
    %56 = arith.addf %53, %55 : vector<8x128xf32>
    %cst_33 = arith.constant 0.000000e+00 : f32
    %57 = vector.broadcast %cst_33 : f32 to vector<8x128xf32>
    %58 = arith.maximumf %56, %57 : vector<8x128xf32>
    %59 = arith.truncf %58 : vector<8x128xf32> to vector<8x128xbf16>
    %c0_34 = arith.constant 0 : index
    %c0_35 = arith.constant 0 : index
    %60 = vector.load %arg10[%c0_34, %c0_35] : memref<128x128xbf16, #tpu.memory_space<vmem>>, vector<128x128xbf16>
    %cst_36 = arith.constant dense<0.000000e+00> : vector<8x128xf32>
    %61 = tpu.matmul %59, %60, %cst_36 {dimension_numbers = #tpu.dot_dimension_numbers<[1], [0], [0], [1], [0, 0, 1, 1], [], []>} : vector<8x128xbf16>, vector<128x128xbf16>, vector<8x128xf32> -> vector<8x128xf32>
    %c0_37 = arith.constant 0 : index
    %c0_38 = arith.constant 0 : index
    %62 = vector.load %arg11[%c0_37, %c0_38] : memref<1x128xf32, #tpu.memory_space<vmem>>, vector<1x128xf32>
    %63 = vector.broadcast %62 : vector<1x128xf32> to vector<8x128xf32>
    %64 = arith.addf %61, %63 : vector<8x128xf32>
    %c0_39 = arith.constant 0 : index
    %c0_40 = arith.constant 0 : index
    %65 = vector.load %arg12[%c0_39, %c0_40] : memref<8x128xf32, #tpu.memory_space<vmem>>, vector<8x128xf32>
    tpu.vector_store %arg12[%c0_39, %c0_40], %64 {strides = array<i32>} : memref<8x128xf32, #tpu.memory_space<vmem>>, vector<8x128xf32>,
    return
  }
  func.func @transform_0(%arg0: i32) -> (i32, i32) {
    %c0_i32 = arith.constant 0 : i32
    %c0_i32_0 = arith.constant 0 : i32
    return %arg0, %c0_i32 : i32, i32
  }
  func.func @transform_1(%arg0: i32) -> (i32, i32) {
    %c0_i32 = arith.constant 0 : i32
    %c0_i32_0 = arith.constant 0 : i32
    %c0_i32_1 = arith.constant 0 : i32
    return %c0_i32, %c0_i32_0 : i32, i32
  }
  func.func @transform_2(%arg0: i32) -> (i32, i32) {
    %c0_i32 = arith.constant 0 : i32
    %c0_i32_0 = arith.constant 0 : i32
    %c0_i32_1 = arith.constant 0 : i32
    return %c0_i32, %c0_i32_0 : i32, i32
  }
  func.func @transform_3(%arg0: i32) -> (i32, i32, i32) {
    %c0_i32 = arith.constant 0 : i32
    %c0_i32_0 = arith.constant 0 : i32
    %c0_i32_1 = arith.constant 0 : i32
    %c0_i32_2 = arith.constant 0 : i32
    return %c0_i32, %c0_i32_0, %c0_i32_1 : i32, i32, i32
  }
  func.func @transform_4(%arg0: i32) -> (i32, i32) {
    %c0_i32 = arith.constant 0 : i32
    %c0_i32_0 = arith.constant 0 : i32
    %c0_i32_1 = arith.constant 0 : i32
    return %c0_i32, %c0_i32_0 : i32, i32
  }
  func.func @transform_5(%arg0: i32) -> (i32, i32) {
    %c0_i32 = arith.constant 0 : i32
    %c0_i32_0 = arith.constant 0 : i32
    %c0_i32_1 = arith.constant 0 : i32
    return %c0_i32, %c0_i32_0 : i32, i32
  }
  func.func @transform_6(%arg0: i32) -> (i32, i32) {
    %c0_i32 = arith.constant 0 : i32
    %c0_i32_0 = arith.constant 0 : i32
    %c0_i32_1 = arith.constant 0 : i32
    return %c0_i32, %c0_i32_0 : i32, i32
  }
  func.func @transform_7(%arg0: i32) -> (i32, i32) {
    %c0_i32 = arith.constant 0 : i32
    %c0_i32_0 = arith.constant 0 : i32
    %c0_i32_1 = arith.constant 0 : i32
    return %c0_i32, %c0_i32_0 : i32, i32
  }
  func.func @transform_8(%arg0: i32) -> (i32, i32) {
    %c0_i32 = arith.constant 0 : i32
    %c0_i32_0 = arith.constant 0 : i32
    %c0_i32_1 = arith.constant 0 : i32
    return %c0_i32, %c0_i32_0 : i32, i32
  }
  func.func @transform_9(%arg0: i32) -> (i32, i32) {
    %c0_i32 = arith.constant 0 : i32
    %c0_i32_0 = arith.constant 0 : i32
    %c0_i32_1 = arith.constant 0 : i32
    return %c0_i32, %c0_i32_0 : i32, i32
  }
  func.func @transform_10(%arg0: i32) -> (i32, i32) {
    %c0_i32 = arith.constant 0 : i32
    %c0_i32_0 = arith.constant 0 : i32
    %c0_i32_1 = arith.constant 0 : i32
    return %c0_i32, %c0_i32_0 : i32, i32
  }
  func.func @transform_11(%arg0: i32) -> (i32, i32) {
    %c0_i32 = arith.constant 0 : i32
    %c0_i32_0 = arith.constant 0 : i32
    return %arg0, %c0_i32 : i32, i32
  }
}

</mosaic_0001>

<bundles_post_ra>
// kernel: net1_forward.1
= control target key start
LH: loop header
LB: loop body
LE: loop exit
PB: predicated region body
PF: predicated region fallthrough
CT: control target
= control target key end

     0   :  { %16 = vsyncpa [#allocation3], 0  ;;  %s5793_s0 = inlined_call_operand.vmem [shape: bf16[32,70], index: 0, kind: input, shape index: {}]   ;;  %s5794_s1 = inlined_call_operand.vmem [shape: bf16[70,2304], index: 1, kind: input, shape index: {}]   ;;  %s5795_s2 = inlined_call_operand.vmem [shape: f32[1,256], index: 2, kind: input, shape index: {}]   ;;  %s5796_s3 = inlined_call_operand.hbm [shape: bf16[4,256,512], index: 3, kind: input, shape index: {}]   ;;  %s5797_s4 = inlined_call_operand.vmem [shape: f32[1,512], index: 4, kind: input, shape index: {}]   ;;  %s5798_s5 = inlined_call_operand.hbm [shape: bf16[512,256], index: 5, kind: input, shape index: {}]   ;;  %s5799_s6 = inlined_call_operand.vmem [shape: f32[1,256], index: 6, kind: input, shape index: {}]   ;;  %s5800_s7 = inlined_call_operand.hbm [shape: bf16[256,128], index: 7, kind: input, shape index: {}]   ;;  %s5801_s8 = inlined_call_operand.vmem [shape: f32[1,128], index: 8, kind: input, shape index: {}]   ;;  %s5802_s9 = inlined_call_operand.vmem [shape: bf16[128,128], index: 9, kind: input, shape index: {}]   ;;  %s5803_s10 = inlined_call_operand.vmem [shape: f32[1,128], index: 10, kind: input, shape index: {}]   ;;  %s5804_s11 = inlined_call_operand.vmem [shape: f32[8,128], index: 11, kind: output, shape index: {}]  }
   0x1   :  { %17 = vsyncpa [#allocation5], 0  ;;  %s5137_s17 = smov [#allocation4]  }
   0x2   :  { %s43_s18 = sshll.u32 %s5137_s17, 4  ;;  %s44_s18 = int_to_ptr.vmem [resolvable:$true] %s43_s18 }
   0x3   :  { %s5081_s19 = scalar_lea.vmem %s44_s18, 8192  ;;  %p5086_p1 = scmp.lt.s32.totalorder %s44_s18, %s44_s18 }
   0x4   :  { %p5082_p0 = scmp.ne.s32.totalorder %s44_s18, %s5081_s19  ;;  %p5087_p2 = scmp.lt.s32.totalorder %s5081_s19, %s5081_s19 }
   0x6   :  { %p5088_p3 = por %p5087_p2, %p5086_p1 }
   0x8   :  { %p5089_p4 = pnand %p5088_p3, %p5082_p0 }
   0xa   :  { %5092 = shalt.err (!%p5089_p4)
}
   0xb   :  { %s5138_s20 = smov 128   ;;  %s5139_s21 = smov 8  }
   0xc   :  { %49 = dma.hbm_to_vmem [thread:$0]  %s5798_s5, 8192, %s44_s18, [#allocation5], %s5138_s20, %s5138_s20, %s5139_s21  }
   0xd   :  { %s5140_s24 = smov [#allocation2]  }
   0xe   :  { %s29_s25 = sshll.u32 %s5140_s24, 4  ;;  %s30_s25 = int_to_ptr.vmem [resolvable:$true] %s29_s25 }
   0xf   :  { %s5101_s26 = scalar_lea.vmem %s30_s25, 32768  ;;  %p5106_p6 = scmp.lt.s32.totalorder %s30_s25, %s30_s25 }
  0x10   :  { %p5102_p5 = scmp.ne.s32.totalorder %s30_s25, %s5101_s26  ;;  %p5107_p7 = scmp.lt.s32.totalorder %s5101_s26, %s5101_s26 }
  0x12   :  { %p5108_p8 = por %p5107_p7, %p5106_p6 }
  0x14   :  { %p5109_p9 = pnand %p5108_p8, %p5102_p5 }
  0x16   :  { %5112 = shalt.err (!%p5109_p9)
}
  0x17   :  { %s5141_s27 = smov 256   ;;  %s5142_s28 = smov 16  }
  0x18   :  { %35 = dma.hbm_to_vmem [thread:$0]  %s5796_s3, 32768, %s30_s25, [#allocation3], %s5141_s27, %s5141_s27, %s5142_s28  }
  0x19   :  { %s5143_s12 = smov [#allocation6]  }
  0x1a   :  { %s57_s13 = sshll.u32 %s5143_s12, 4  ;;  %s58_s13 = int_to_ptr.vmem [resolvable:$true] %s57_s13 }
  0x1b   :  { %s5121_s5 = scalar_lea.vmem %s58_s13, 2048  ;;  %p5126_p11 = scmp.lt.s32.totalorder %s58_s13, %s58_s13 }
  0x1c   :  { %p5122_p10 = scmp.ne.s32.totalorder %s58_s13, %s5121_s5  ;;  %p5127_p12 = scmp.lt.s32.totalorder %s5121_s5, %s5121_s5 }
  0x1e   :  { %p5128_p13 = por %p5127_p12, %p5126_p11 }
  0x20   :  { %p5129_p0 = pnand %p5128_p13, %p5122_p10 }
  0x22   :  { %5132 = shalt.err (!%p5129_p0)
}
  0x23   :  { %s5144_s14 = smov 64   ;;  %s5145_s15 = smov 4  }
  0x24   :  { %63 = dma.hbm_to_vmem [thread:$0]  %s5800_s7, 2048, %s58_s13, [#allocation5], %s5144_s14, %s5144_s14, %s5145_s15  }
  0x25   :  { %5133 = dma.done.wait [#allocation3], 32768  }
  0x26   :  { %5134 = vsyncadd [#allocation3], 4294934528 }
  0x27   :  { %5135 = dma.done.wait [#allocation5], 10240  }
  0x28   :  { %5136 = vsyncadd [#allocation5], 4294957056  ;;  %v5146_v0 = vmov 0   ;;  %v156_v1 = vld [vmem:[%s5794_s1 + $0x240] sm:$0x77]  ;;  %vm587_vm0 = vcmask 1042432  }
  0x29   :  { %674 = vmatprep.mubr.bf16.mxu0 %v5146_v0  ;;  %727 = vmatprep.mubr.bf16.mxu1 %v5146_v0  ;;  %v157_v2 = vld [vmem:[%s5794_s1 + $0x248] sm:$0x77]  ;;  %v3988_v3 = vcombine.high %v156_v1, %v156_v1  ;;  %v3987_v5 = vcombine.low %v156_v1, %v156_v1  ;;  %v4445_v7 = vld [vmem:[%s5794_s1 + $0x1b4] ss:$72 sps:$4 sm:$0xff]   ;;  %v4449_v11 = vld [vmem:[%s5794_s1 + $0x1b0] ss:$72 sps:$4 sm:$0xff]  }
  0x2a   :  { %v3990_v4 = vcombine.high %v157_v2, %v157_v2  ;;  %v3989_v6 = vcombine.low %v157_v2, %v157_v2  ;;  %v4447_v8 = vld [vmem:[%s5794_s1 + $0x1bc] ss:$72 sps:$4 sm:$0xff]   ;;  %v4450_v12 = vld [vmem:[%s5794_s1 + $0x1b8] ss:$72 sps:$4 sm:$0xff]   ;;  %v4453_v14 = vld [vmem:[%s5794_s1 + $0x12c] ss:$72 sps:$4 sm:$0xff]  }
  0x2b   :  { %4005 = vmatprep.subr.msk.bf16.mxu0 %vm587_vm0, %v3988_v3  ;;  %v589_v9 = vsel %vm587_vm0, %v3987_v5, 0  ;;  %v4451_v13 = vld [vmem:[%s5794_s1 + $0x124] ss:$72 sps:$4 sm:$0xff]   ;;  %v4455_v15 = vld [vmem:[%s5794_s1 + $0x120] ss:$72 sps:$4 sm:$0xff]   ;;  %vm580_vm1 = vcmask 572416  }
  0x2c   :  { %4008 = vmatprep.subr.msk.bf16.mxu1 %vm587_vm0, %v3990_v4  ;;  %v595_v10 = vsel %vm587_vm0, %v3989_v6, 0  ;;  %649 = vmatpush1.bf16.msra.mxu0 %v589_v9  ;;  %v4456_v16 = vld [vmem:[%s5794_s1 + $0x128] ss:$72 sps:$4 sm:$0xff]   ;;  %v4457_v17 = vld [vmem:[%s5794_s1 + $0x94] ss:$72 sps:$4 sm:$0xff]   ;;  %v5287_v31 = vld [vmem:[%s5793_s0] sm:$0xff]  }
  0x2d   :  { %702 = vmatpush1.bf16.msra.mxu1 %v595_v10  ;;  %650 = vmatprep.subr.bf16.mxu0 %v4445_v7  ;;  %v4459_v18 = vld [vmem:[%s5794_s1 + $0x9c] ss:$72 sps:$4 sm:$0xff]   ;;  %v4461_v19 = vld [vmem:[%s5794_s1 + $0x90] ss:$72 sps:$4 sm:$0xff]   ;;  %v4465_v22 = vld [vmem:[%s5794_s1 + $0xc] ss:$72 sps:$4 sm:$0xff]  }
  0x2e   :  { %703 = vmatprep.subr.bf16.mxu1 %v4447_v8  ;;  %v4462_v20 = vld [vmem:[%s5794_s1 + $0x98] ss:$72 sps:$4 sm:$0xff]   ;;  %v4463_v21 = vld [vmem:[%s5794_s1 + $0x4] ss:$72 sps:$4 sm:$0xff]   ;;  %v158_v23 = vld [vmem:[%s5794_s1 + $0x250] sm:$0x77] }
  0x2f   :  { %v159_v24 = vld [vmem:[%s5794_s1 + $0x258] sm:$0x77]  ;;  %v4467_v25 = vld [vmem:[%s5794_s1] ss:$72 sps:$4 sm:$0xff]   ;;  %v3992_v27 = vcombine.high %v158_v23, %v158_v23  ;;  %v3991_v29 = vcombine.low %v158_v23, %v158_v23  ;;  %v4476_v32 = vld [vmem:[%s5794_s1 + $0x1c4] ss:$72 sps:$4 sm:$0xff]  }
  0x30   :  { %651 = vmatpush1.bf16.msra.mxu0 %v4449_v11  ;;  %v4468_v26 = vld [vmem:[%s5794_s1 + $0x8] ss:$72 sps:$4 sm:$0xff]   ;;  %v3994_v28 = vcombine.high %v159_v24, %v159_v24  ;;  %v3993_v30 = vcombine.low %v159_v24, %v159_v24  ;;  %v4479_v35 = vld [vmem:[%s5794_s1 + $0x1cc] ss:$72 sps:$4 sm:$0xff]   ;;  %v4486_v39 = vld [vmem:[%s5794_s1 + $0x13c] ss:$72 sps:$4 sm:$0xff]  }
  0x31   :  { %704 = vmatpush1.bf16.msra.mxu1 %v4450_v12  ;;  %652 = vmatprep.subr.bf16.mxu0 %v4451_v13  ;;  %v601_v33 = vsel %vm587_vm0, %v3991_v29, 0  ;;  %v4474_v36 = vld [vmem:[%s5794_s1 + $0x1c0] ss:$72 sps:$4 sm:$0xff]   ;;  %v4483_v38 = vld [vmem:[%s5794_s1 + $0x134] ss:$72 sps:$4 sm:$0xff]   ;;  %vm5148_vm2 = vmmov 0  }
  0x32   :  { %705 = vmatprep.subr.bf16.mxu1 %v4453_v14  ;;  %v607_v34 = vsel %vm587_vm0, %v3993_v30, 0  ;;  %v4477_v37 = vld [vmem:[%s5794_s1 + $0x1c8] ss:$72 sps:$4 sm:$0xff]   ;;  %v4484_v42 = vld [vmem:[%s5794_s1 + $0x138] ss:$72 sps:$4 sm:$0xff]  }
  0x33   :  { %v5319_v40 = vld [vmem:[%s5793_s0 + $0x8] sm:$0xff]   ;;  %v4481_v41 = vld [vmem:[%s5794_s1 + $0x130] ss:$72 sps:$4 sm:$0xff]   ;;  %v4495_v47 = vld [vmem:[%s5794_s1 + $0x14] ss:$72 sps:$4 sm:$0xff]  }
  0x34   :  { %653 = vmatpush1.bf16.msra.mxu0 %v4455_v15  ;;  %v4489_v43 = vld [vmem:[%s5794_s1 + $0xa4] ss:$72 sps:$4 sm:$0xff]   ;;  %v4487_v45 = vld [vmem:[%s5794_s1 + $0xa0] ss:$72 sps:$4 sm:$0xff]   ;;  %v4493_v51 = vld [vmem:[%s5794_s1 + $0x10] ss:$72 sps:$4 sm:$0xff]  }
  0x35   :  { %706 = vmatpush1.bf16.msra.mxu1 %v4456_v16  ;;  %654 = vmatprep.subr.bf16.mxu0 %v4457_v17  ;;  %v4492_v44 = vld [vmem:[%s5794_s1 + $0xac] ss:$72 sps:$4 sm:$0xff]   ;;  %v4490_v46 = vld [vmem:[%s5794_s1 + $0xa8] ss:$72 sps:$4 sm:$0xff]   ;;  %v4498_v48 = vld [vmem:[%s5794_s1 + $0x1c] ss:$72 sps:$4 sm:$0xff]  }
  0x36   :  { %707 = vmatprep.subr.bf16.mxu1 %v4459_v18  ;;  %v160_v49 = vld [vmem:[%s5794_s1 + $0x260] sm:$0x77]  ;;  %v161_v50 = vld [vmem:[%s5794_s1 + $0x268] sm:$0x77]  ;;  %v4505_v57 = vld [vmem:[%s5794_s1 + $0x1d4] ss:$72 sps:$4 sm:$0xff]  }
  0x37   :  { %v4496_v52 = vld [vmem:[%s5794_s1 + $0x18] ss:$72 sps:$4 sm:$0xff]   ;;  %v3996_v53 = vcombine.high %v160_v49, %v160_v49  ;;  %v3998_v54 = vcombine.high %v161_v50, %v161_v50  ;;  %v3995_v55 = vcombine.low %v160_v49, %v160_v49  ;;  %v3997_v56 = vcombine.low %v161_v50, %v161_v50  ;;  %v4508_v60 = vld [vmem:[%s5794_s1 + $0x1dc] ss:$72 sps:$4 sm:$0xff]   ;;  %v4514_v1 = vld [vmem:[%s5794_s1 + $0x14c] ss:$72 sps:$4 sm:$0xff]  }
  0x38   :  { %655 = vmatpush1.bf16.msra.mxu0 %v4461_v19  ;;  %v4503_v61 = vld [vmem:[%s5794_s1 + $0x1d0] ss:$72 sps:$4 sm:$0xff]   ;;  %v4511_v63 = vld [vmem:[%s5794_s1 + $0x144] ss:$72 sps:$4 sm:$0xff]   ;;  %v4509_v2 = vld [vmem:[%s5794_s1 + $0x140] ss:$72 sps:$4 sm:$0xff]  }
  0x39   :  { %708 = vmatpush1.bf16.msra.mxu1 %v4462_v20  ;;  %656 = vmatprep.subr.bf16.mxu0 %v4463_v21  ;;  %v613_v58 = vsel %vm587_vm0, %v3995_v55, 0  ;;  %v619_v59 = vsel %vm587_vm0, %v3997_v56, 0  ;;  %v4506_v62 = vld [vmem:[%s5794_s1 + $0x1d8] ss:$72 sps:$4 sm:$0xff]   ;;  %v4512_v3 = vld [vmem:[%s5794_s1 + $0x148] ss:$72 sps:$4 sm:$0xff]  }
  0x3a   :  { %709 = vmatprep.subr.bf16.mxu1 %v4465_v22  ;;  %v4517_v4 = vld [vmem:[%s5794_s1 + $0xb4] ss:$72 sps:$4 sm:$0xff]   ;;  %v4515_v6 = vld [vmem:[%s5794_s1 + $0xb0] ss:$72 sps:$4 sm:$0xff]   ;;  %v4523_v8 = vld [vmem:[%s5794_s1 + $0x24] ss:$72 sps:$4 sm:$0xff]  }
  0x3b   :  { %v4520_v5 = vld [vmem:[%s5794_s1 + $0xbc] ss:$72 sps:$4 sm:$0xff]   ;;  %v4518_v7 = vld [vmem:[%s5794_s1 + $0xb8] ss:$72 sps:$4 sm:$0xff]   ;;  %v4526_v9 = vld [vmem:[%s5794_s1 + $0x2c] ss:$72 sps:$4 sm:$0xff]  }
  0x3c   :  { %657 = vmatpush1.bf16.msra.mxu0 %v4467_v25  ;;  %v162_v10 = vld [vmem:[%s5794_s1 + $0x270] sm:$0x77]  ;;  %v163_v11 = vld [vmem:[%s5794_s1 + $0x278] sm:$0x77]  ;;  %v4521_v12 = vld [vmem:[%s5794_s1 + $0x20] ss:$72 sps:$4 sm:$0xff]  }
  0x3d   :  { %710 = vmatpush1.bf16.msra.mxu1 %v4468_v26  ;;  %4011 = vmatprep.subr.msk.bf16.mxu0 %vm587_vm0, %v3992_v27  ;;  %v4524_v13 = vld [vmem:[%s5794_s1 + $0x28] ss:$72 sps:$4 sm:$0xff]   ;;  %v4000_v14 = vcombine.high %v162_v10, %v162_v10  ;;  %v4002_v15 = vcombine.high %v163_v11, %v163_v11  ;;  %v3999_v16 = vcombine.low %v162_v10, %v162_v10  ;;  %v4533_v18 = vld [vmem:[%s5794_s1 + $0x1e4] ss:$72 sps:$4 sm:$0xff]   ;;  %v4539_v24 = vld [vmem:[%s5794_s1 + $0x154] ss:$72 sps:$4 sm:$0xff]  }
  0x3e   :  { %4014 = vmatprep.subr.msk.bf16.mxu1 %vm587_vm0, %v3994_v28  ;;  %v4001_v17 = vcombine.low %v163_v11, %v163_v11  ;;  %v4536_v19 = vld [vmem:[%s5794_s1 + $0x1ec] ss:$72 sps:$4 sm:$0xff]   ;;  %v4531_v22 = vld [vmem:[%s5794_s1 + $0x1e0] ss:$72 sps:$4 sm:$0xff]   ;;  %v4542_v25 = vld [vmem:[%s5794_s1 + $0x15c] ss:$72 sps:$4 sm:$0xff]  }
  0x3f   :  { %4006 = vmatmul.mubr.msk.bf16.vlgmr.msra.gmra.mxu0 %vm580_vm1, %v5287_v31  ;;  %v625_v20 = vsel %vm587_vm0, %v3999_v16, 0  ;;  %v4534_v23 = vld [vmem:[%s5794_s1 + $0x1e8] ss:$72 sps:$4 sm:$0xff]   ;;  %v4540_v27 = vld [vmem:[%s5794_s1 + $0x158] ss:$72 sps:$4 sm:$0xff]  }
  0x40   :  { %4009 = vmatmul.mubr.msk.bf16.vlgmr.msra.gmra.mxu1 %vm580_vm1, %v5287_v31  ;;  %755 = vmatpush1.bf16.msra.mxu0 %v601_v33  ;;  %v631_v21 = vsel %vm587_vm0, %v4001_v17, 0  ;;  %v4537_v26 = vld [vmem:[%s5794_s1 + $0x150] ss:$72 sps:$4 sm:$0xff]   ;;  %v4545_v28 = vld [vmem:[%s5794_s1 + $0xc4] ss:$72 sps:$4 sm:$0xff]  }
  0x41   :  { %808 = vmatpush1.bf16.msra.mxu1 %v607_v34  ;;  %756 = vmatprep.subr.bf16.mxu0 %v4476_v32  ;;  %v4548_v29 = vld [vmem:[%s5794_s1 + $0xcc] ss:$72 sps:$4 sm:$0xff]   ;;  %v4543_v30 = vld [vmem:[%s5794_s1 + $0xc0] ss:$72 sps:$4 sm:$0xff]   ;;  %v4554_v34 = vld [vmem:[%s5794_s1 + $0x3c] ss:$72 sps:$4 sm:$0xff]  }
  0x42   :  { %809 = vmatprep.subr.bf16.mxu1 %v4479_v35  ;;  %684 = vmatprep.mubr.bf16.mxu0 %v5146_v0  ;;  %v4546_v32 = vld [vmem:[%s5794_s1 + $0xc8] ss:$72 sps:$4 sm:$0xff]   ;;  %v4551_v33 = vld [vmem:[%s5794_s1 + $0x34] ss:$72 sps:$4 sm:$0xff]   ;;  %v164_v35 = vld [vmem:[%s5794_s1 + $0x280] sm:$0x77] }
  0x43   :  { %737 = vmatprep.mubr.bf16.mxu1 %v5146_v0  ;;  %v4566_v49 = vld [vmem:[%s5794_s1 + $0x40] ss:$72 sps:$4 sm:$0xff]   ;;  %v4571_v50 = vld [vmem:[#allocation2 + $0x2e4] ss:$16 sps:$4 sm:$0xff]   ;;  %v4610_v11 = vld [vmem:[#allocation2 + $0x22c] ss:$16 sps:$4 sm:$0xff]  }
  0x44   :  { %757 = vmatpush1.bf16.msra.mxu0 %v4474_v36  ;;  %v4549_v36 = vld [vmem:[%s5794_s1 + $0x30] ss:$72 sps:$4 sm:$0xff]   ;;  %v4577_v55 = vld [vmem:[#allocation2 + $0x2c4] ss:$16 sps:$4 sm:$0xff]   ;;  %v4622_v17 = vld [vmem:[#allocation2 + $0x3ec] ss:$16 sps:$4 sm:$0xff]  }
  0x45   :  { %810 = vmatpush1.bf16.msra.mxu1 %v4477_v37  ;;  %758 = vmatprep.subr.bf16.mxu0 %v4483_v38  ;;  %v4552_v37 = vld [vmem:[%s5794_s1 + $0x38] ss:$72 sps:$4 sm:$0xff]   ;;  %v4004_v38 = vcombine.high %v164_v35, %v164_v35  ;;  %v4619_v16 = vld [vmem:[#allocation2 + $0x3e4] ss:$16 sps:$4 sm:$0xff]  }
  0x46   :  { %811 = vmatprep.subr.bf16.mxu1 %v4486_v39  ;;  %v4003_v39 = vcombine.low %v164_v35, %v164_v35  ;;  %v4578_v56 = vld [vmem:[#allocation2 + $0x2c8] ss:$16 sps:$4 sm:$0xff]   ;;  %v4641_v35 = vld [vmem:[#allocation2 + $0x360] ss:$16 sps:$4 sm:$0xff]  }
  0x47   :  { %4007 = vmatmul.mubr.msk.bf16.gmra.mxu0 %vm580_vm1, %v5319_v40  ;;  %v4608_v10 = vld [vmem:[#allocation2 + $0x228] ss:$16 sps:$4 sm:$0xff]  }
  0x48   :  { %4010 = vmatmul.mubr.msk.bf16.gmra.mxu1 %vm580_vm1, %v5319_v40  ;;  %759 = vmatpush1.bf16.msra.mxu0 %v4481_v41  ;;  %v4559_v41 = vld [vmem:[%s5794_s1 + $0x1f4] ss:$72 sps:$4 sm:$0xff]  }
  0x49   :  { %812 = vmatpush1.bf16.msra.mxu1 %v4484_v42  ;;  %760 = vmatprep.subr.bf16.mxu0 %v4489_v43  ;;  %v637_v42 = vsel %vm587_vm0, %v4003_v39, 0  ;;  %v4557_v43 = vld [vmem:[%s5794_s1 + $0x1f0] ss:$72 sps:$4 sm:$0xff]  }
  0x4a   :  { %813 = vmatprep.subr.bf16.mxu1 %v4492_v44  ;;  %780 = vmatprep.mubr.bf16.mxu0 %v5146_v0  ;;  %v4562_v44 = vld [vmem:[%s5794_s1 + $0x164] ss:$72 sps:$4 sm:$0xff]   ;;  %v4647_v39 = vld [vmem:[#allocation2 + $0x340] ss:$16 sps:$4 sm:$0xff]  }
  0x4b   :  { %833 = vmatprep.mubr.bf16.mxu1 %v5146_v0 }
  0x4c   :  { %761 = vmatpush1.bf16.msra.mxu0 %v4487_v45  ;;  %v4560_v45 = vld [vmem:[%s5794_s1 + $0x160] ss:$72 sps:$4 sm:$0xff]  }
  0x4d   :  { %814 = vmatpush1.bf16.msra.mxu1 %v4490_v46  ;;  %762 = vmatprep.subr.bf16.mxu0 %v4495_v47  ;;  %v4565_v46 = vld [vmem:[%s5794_s1 + $0xd4] ss:$72 sps:$4 sm:$0xff]   ;;  %v4563_v47 = vld [vmem:[%s5794_s1 + $0xd0] ss:$72 sps:$4 sm:$0xff]  }
  0x4e   :  { %815 = vmatprep.subr.bf16.mxu1 %v4498_v48  ;;  %v4568_v48 = vld [vmem:[%s5794_s1 + $0x44] ss:$72 sps:$4 sm:$0xff]  }
  0x50   :  { %763 = vmatpush1.bf16.msra.mxu0 %v4493_v51  ;;  %v4574_v51 = vld [vmem:[#allocation2 + $0x2ec] ss:$16 sps:$4 sm:$0xff]  }
  0x51   :  { %816 = vmatpush1.bf16.msra.mxu1 %v4496_v52  ;;  %4017 = vmatprep.subr.msk.bf16.mxu0 %vm587_vm0, %v3996_v53  ;;  %v4569_v52 = vld [vmem:[#allocation2 + $0x2e0] ss:$16 sps:$4 sm:$0xff]   ;;  %v4572_v53 = vld [vmem:[#allocation2 + $0x2e8] ss:$16 sps:$4 sm:$0xff]  }
  0x52   :  { %4020 = vmatprep.subr.msk.bf16.mxu1 %vm587_vm0, %v3998_v54  ;;  %v4575_v54 = vld [vmem:[#allocation2 + $0x2c0] ss:$16 sps:$4 sm:$0xff]  }
  0x53   :  { %4012 = vmatmul.mubr.msk.bf16.vlgmr.msra.gmra.mxu0 %vm580_vm1, %v5287_v31 }
  0x54   :  { %4015 = vmatmul.mubr.msk.bf16.vlgmr.msra.gmra.mxu1 %vm580_vm1, %v5287_v31  ;;  %861 = vmatpush1.bf16.msra.mxu0 %v613_v58  ;;  %v4581_v58 = vld [vmem:[#allocation2 + $0x2a0] ss:$16 sps:$4 sm:$0xff]  }
  0x55   :  { %914 = vmatpush1.bf16.msra.mxu1 %v619_v59  ;;  %862 = vmatprep.subr.bf16.mxu0 %v4505_v57  ;;  %v4580_v57 = vld [vmem:[#allocation2 + $0x2cc] ss:$16 sps:$4 sm:$0xff]   ;;  %v4589_v59 = vld [vmem:[#allocation2 + $0x284] ss:$16 sps:$4 sm:$0xff]  }
  0x56   :  { %915 = vmatprep.subr.bf16.mxu1 %v4508_v60  ;;  %790 = vmatprep.mubr.bf16.mxu0 %v5146_v0  ;;  %v4592_v60 = vld [vmem:[#allocation2 + $0x28c] ss:$16 sps:$4 sm:$0xff]  }
  0x57   :  { %843 = vmatprep.mubr.bf16.mxu1 %v5146_v0 }
  0x58   :  { %863 = vmatpush1.bf16.msra.mxu0 %v4503_v61  ;;  %v4587_v61 = vld [vmem:[#allocation2 + $0x280] ss:$16 sps:$4 sm:$0xff]  }
  0x59   :  { %916 = vmatpush1.bf16.msra.mxu1 %v4506_v62  ;;  %864 = vmatprep.subr.bf16.mxu0 %v4511_v63  ;;  %v4590_v62 = vld [vmem:[#allocation2 + $0x288] ss:$16 sps:$4 sm:$0xff]   ;;  %v4595_v63 = vld [vmem:[#allocation2 + $0x264] ss:$16 sps:$4 sm:$0xff]  }
  0x5a   :  { %917 = vmatprep.subr.bf16.mxu1 %v4514_v1  ;;  %v4598_v1 = vld [vmem:[#allocation2 + $0x26c] ss:$16 sps:$4 sm:$0xff]  }
  0x5b   :  { %4013 = vmatmul.mubr.msk.bf16.gmra.mxu0 %vm580_vm1, %v5319_v40 }
  0x5c   :  { %4016 = vmatmul.mubr.msk.bf16.gmra.mxu1 %vm580_vm1, %v5319_v40  ;;  %865 = vmatpush1.bf16.msra.mxu0 %v4509_v2  ;;  %v4593_v2 = vld [vmem:[#allocation2 + $0x260] ss:$16 sps:$4 sm:$0xff]  }
  0x5d   :  { %918 = vmatpush1.bf16.msra.mxu1 %v4512_v3  ;;  %866 = vmatprep.subr.bf16.mxu0 %v4517_v4  ;;  %v4596_v3 = vld [vmem:[#allocation2 + $0x268] ss:$16 sps:$4 sm:$0xff]   ;;  %v4601_v4 = vld [vmem:[#allocation2 + $0x244] ss:$16 sps:$4 sm:$0xff]  }
  0x5e   :  { %919 = vmatprep.subr.bf16.mxu1 %v4520_v5  ;;  %886 = vmatprep.mubr.bf16.mxu0 %v5146_v0  ;;  %v4604_v5 = vld [vmem:[#allocation2 + $0x24c] ss:$16 sps:$4 sm:$0xff]  }
  0x5f   :  { %939 = vmatprep.mubr.bf16.mxu1 %v5146_v0 }
  0x60   :  { %867 = vmatpush1.bf16.msra.mxu0 %v4515_v6  ;;  %v4599_v6 = vld [vmem:[#allocation2 + $0x240] ss:$16 sps:$4 sm:$0xff]  }
  0x61   :  { %920 = vmatpush1.bf16.msra.mxu1 %v4518_v7  ;;  %868 = vmatprep.subr.bf16.mxu0 %v4523_v8  ;;  %v4602_v7 = vld [vmem:[#allocation2 + $0x248] ss:$16 sps:$4 sm:$0xff]   ;;  %v4605_v8 = vld [vmem:[#allocation2 + $0x220] ss:$16 sps:$4 sm:$0xff]  }
  0x62   :  { %921 = vmatprep.subr.bf16.mxu1 %v4526_v9  ;;  %v4607_v9 = vld [vmem:[#allocation2 + $0x224] ss:$16 sps:$4 sm:$0xff]  }
  0x64   :  { %869 = vmatpush1.bf16.msra.mxu0 %v4521_v12  ;;  %v4613_v12 = vld [vmem:[#allocation2 + $0x204] ss:$16 sps:$4 sm:$0xff]  }
  0x65   :  { %922 = vmatpush1.bf16.msra.mxu1 %v4524_v13  ;;  %4023 = vmatprep.subr.msk.bf16.mxu0 %vm587_vm0, %v4000_v14  ;;  %v4616_v13 = vld [vmem:[#allocation2 + $0x20c] ss:$16 sps:$4 sm:$0xff]   ;;  %v4611_v14 = vld [vmem:[#allocation2 + $0x200] ss:$16 sps:$4 sm:$0xff]  }
  0x66   :  { %4026 = vmatprep.subr.msk.bf16.mxu1 %vm587_vm0, %v4002_v15  ;;  %v4614_v15 = vld [vmem:[#allocation2 + $0x208] ss:$16 sps:$4 sm:$0xff]  }
  0x67   :  { %4018 = vmatmul.mubr.msk.bf16.vlgmr.msra.gmra.mxu0 %vm580_vm1, %v5287_v31 }
  0x68   :  { %4021 = vmatmul.mubr.msk.bf16.vlgmr.msra.gmra.mxu1 %vm580_vm1, %v5287_v31  ;;  %967 = vmatpush1.bf16.msra.mxu0 %v625_v20  ;;  %v4625_v20 = vld [vmem:[#allocation2 + $0x3c4] ss:$16 sps:$4 sm:$0xff]  }
  0x69   :  { %1020 = vmatpush1.bf16.msra.mxu1 %v631_v21  ;;  %968 = vmatprep.subr.bf16.mxu0 %v4533_v18  ;;  %v4617_v18 = vld [vmem:[#allocation2 + $0x3e0] ss:$16 sps:$4 sm:$0xff]   ;;  %v4628_v21 = vld [vmem:[#allocation2 + $0x3cc] ss:$16 sps:$4 sm:$0xff]  }
  0x6a   :  { %1021 = vmatprep.subr.bf16.mxu1 %v4536_v19  ;;  %896 = vmatprep.mubr.bf16.mxu0 %v5146_v0  ;;  %v4620_v19 = vld [vmem:[#allocation2 + $0x3e8] ss:$16 sps:$4 sm:$0xff]  }
  0x6b   :  { %949 = vmatprep.mubr.bf16.mxu1 %v5146_v0 }
  0x6c   :  { %969 = vmatpush1.bf16.msra.mxu0 %v4531_v22  ;;  %v4623_v22 = vld [vmem:[#allocation2 + $0x3c0] ss:$16 sps:$4 sm:$0xff]  }
  0x6d   :  { %1022 = vmatpush1.bf16.msra.mxu1 %v4534_v23  ;;  %970 = vmatprep.subr.bf16.mxu0 %v4539_v24  ;;  %v4626_v23 = vld [vmem:[#allocation2 + $0x3c8] ss:$16 sps:$4 sm:$0xff]   ;;  %v4631_v24 = vld [vmem:[#allocation2 + $0x3a4] ss:$16 sps:$4 sm:$0xff]  }
  0x6e   :  { %1023 = vmatprep.subr.bf16.mxu1 %v4542_v25  ;;  %v4634_v25 = vld [vmem:[#allocation2 + $0x3ac] ss:$16 sps:$4 sm:$0xff]  }
  0x6f   :  { %4019 = vmatmul.mubr.msk.bf16.gmra.mxu0 %vm580_vm1, %v5319_v40 }
  0x70   :  { %4022 = vmatmul.mubr.msk.bf16.gmra.mxu1 %vm580_vm1, %v5319_v40  ;;  %971 = vmatpush1.bf16.msra.mxu0 %v4537_v26  ;;  %v4629_v26 = vld [vmem:[#allocation2 + $0x3a0] ss:$16 sps:$4 sm:$0xff]  }
  0x71   :  { %1024 = vmatpush1.bf16.msra.mxu1 %v4540_v27  ;;  %972 = vmatprep.subr.bf16.mxu0 %v4545_v28  ;;  %v4632_v27 = vld [vmem:[#allocation2 + $0x3a8] ss:$16 sps:$4 sm:$0xff]   ;;  %v4635_v28 = vld [vmem:[#allocation2 + $0x380] ss:$16 sps:$4 sm:$0xff]  }
  0x72   :  { %1025 = vmatprep.subr.bf16.mxu1 %v4548_v29  ;;  %992 = vmatprep.mubr.bf16.mxu0 %v5146_v0  ;;  %v4637_v29 = vld [vmem:[#allocation2 + $0x384] ss:$16 sps:$4 sm:$0xff]  }
  0x73   :  { %1045 = vmatprep.mubr.bf16.mxu1 %v5146_v0 }
  0x74   :  { %973 = vmatpush1.bf16.msra.mxu0 %v4543_v30  ;;  %v4638_v30 = vld [vmem:[#allocation2 + $0x388] ss:$16 sps:$4 sm:$0xff]  }
  0x75   :  { %1026 = vmatpush1.bf16.msra.mxu1 %v4546_v32  ;;  %974 = vmatprep.subr.bf16.mxu0 %v4551_v33  ;;  %v4640_v32 = vld [vmem:[#allocation2 + $0x38c] ss:$16 sps:$4 sm:$0xff]   ;;  %v4643_v33 = vld [vmem:[#allocation2 + $0x364] ss:$16 sps:$4 sm:$0xff]  }
  0x76   :  { %1027 = vmatprep.subr.bf16.mxu1 %v4554_v34  ;;  %v4646_v34 = vld [vmem:[#allocation2 + $0x36c] ss:$16 sps:$4 sm:$0xff]  }
  0x78   :  { %975 = vmatpush1.bf16.msra.mxu0 %v4549_v36  ;;  %v4644_v36 = vld [vmem:[#allocation2 + $0x368] ss:$16 sps:$4 sm:$0xff]  }
  0x79   :  { %1028 = vmatpush1.bf16.msra.mxu1 %v4552_v37  ;;  %4029 = vmatprep.subr.msk.bf16.mxu0 %vm587_vm0, %v4004_v38  ;;  %v4649_v37 = vld [vmem:[#allocation2 + $0x344] ss:$16 sps:$4 sm:$0xff]   ;;  %v4652_v38 = vld [vmem:[#allocation2 + $0x34c] ss:$16 sps:$4 sm:$0xff]  }
  0x7a   :  { %1670 = vmatprep.subr.bf16.mxu1 %v4571_v50  ;;  %v4667_v50 = vld [vmem:[#allocation2 + $0xe4] ss:$16 sps:$4 sm:$0xff]  }
  0x7b   :  { %4024 = vmatmul.mubr.msk.bf16.vlgmr.msra.gmra.mxu0 %vm580_vm1, %v5287_v31 }
  0x7c   :  { %4027 = vmatmul.mubr.msk.bf16.vlgmr.msra.gmra.mxu1 %vm580_vm1, %v5287_v31  ;;  %1073 = vmatpush1.bf16.msra.mxu0 %v637_v42  ;;  %v4655_v42 = vld [vmem:[#allocation2 + $0x324] ss:$16 sps:$4 sm:$0xff]  }
  0x7d   :  { %1002 = vmatprep.mubr.bf16.mxu0 %v5146_v0  ;;  %1074 = vmatprep.subr.bf16.mxu0 %v4559_v41  ;;  %v4650_v41 = vld [vmem:[#allocation2 + $0x348] ss:$16 sps:$4 sm:$0xff]  }
  0x7e   :  { %1055 = vmatprep.mubr.bf16.mxu1 %v5146_v0  ;;  %1671 = vmatpush1.bf16.msra.mxu1 %v4569_v52 }
  0x7f   :  { %1672 = vmatprep.subr.bf16.mxu1 %v4577_v55 }
  0x80   :  { %1075 = vmatpush1.bf16.msra.mxu0 %v4557_v43  ;;  %v4658_v43 = vld [vmem:[#allocation2 + $0x32c] ss:$16 sps:$4 sm:$0xff]  }
  0x81   :  { %1076 = vmatprep.subr.bf16.mxu0 %v4562_v44  ;;  %v4653_v44 = vld [vmem:[#allocation2 + $0x320] ss:$16 sps:$4 sm:$0xff]  }
  0x82   :  { %1673 = vmatpush1.bf16.msra.mxu1 %v4575_v54 }
  0x83   :  { %4025 = vmatmul.mubr.msk.bf16.gmra.mxu0 %vm580_vm1, %v5319_v40 }
  0x84   :  { %4028 = vmatmul.mubr.msk.bf16.gmra.mxu1 %vm580_vm1, %v5319_v40  ;;  %1077 = vmatpush1.bf16.msra.mxu0 %v4560_v45  ;;  %v4656_v45 = vld [vmem:[#allocation2 + $0x328] ss:$16 sps:$4 sm:$0xff]  }
  0x85   :  { %1098 = vmatprep.mubr.bf16.mxu0 %v5146_v0  ;;  %1078 = vmatprep.subr.bf16.mxu0 %v4565_v46  ;;  %v4661_v46 = vld [vmem:[#allocation2 + $0x304] ss:$16 sps:$4 sm:$0xff]  }
  0x88   :  { %1079 = vmatpush1.bf16.msra.mxu0 %v4563_v47  ;;  %v4664_v47 = vld [vmem:[#allocation2 + $0x30c] ss:$16 sps:$4 sm:$0xff]  }
  0x89   :  { %1080 = vmatprep.subr.bf16.mxu0 %v4568_v48  ;;  %v4659_v48 = vld [vmem:[#allocation2 + $0x300] ss:$16 sps:$4 sm:$0xff]  }
  0x8c   :  { %1081 = vmatpush1.bf16.msra.mxu0 %v4566_v49  ;;  %v4662_v49 = vld [vmem:[#allocation2 + $0x308] ss:$16 sps:$4 sm:$0xff]  }
  0x8d   :  { %1711 = vmatprep.subr.bf16.mxu0 %v4574_v51  ;;  %v4670_v51 = vld [vmem:[#allocation2 + $0xec] ss:$16 sps:$4 sm:$0xff]  }
  0x8f   :  { %4030 = vmatmul.mubr.msk.bf16.vlgmr.msra.gmra.mxu0 %vm580_vm1, %v5287_v31  ;;  %v4586_v31 = vld [vmem:[#allocation2 + $0x2ac] ss:$16 sps:$4 sm:$0xff]  }
  0x90   :  { %1108 = vmatprep.mubr.bf16.mxu0 %v5146_v0  ;;  %1712 = vmatpush1.bf16.msra.mxu0 %v4572_v53  ;;  %v4583_v0 = vld [vmem:[#allocation2 + $0x2a4] ss:$16 sps:$4 sm:$0xff]  }
  0x91   :  { %1713 = vmatprep.subr.bf16.mxu0 %v4580_v57  ;;  %1674 = vmatprep.subr.bf16.mxu1 %v4583_v0 }
  0x92   :  { %1675 = vmatpush1.bf16.msra.mxu1 %v4581_v58 }
  0x93   :  { %1676 = vmatprep.subr.bf16.mxu1 %v4589_v59 }
  0x94   :  { %1714 = vmatpush1.bf16.msra.mxu0 %v4578_v56 }
  0x95   :  { %1715 = vmatprep.subr.bf16.mxu0 %v4586_v31 }
  0x96   :  { %1677 = vmatpush1.bf16.msra.mxu1 %v4587_v61 }
  0x97   :  { %4031 = vmatmul.mubr.msk.bf16.gmra.mxu0 %vm580_vm1, %v5319_v40  ;;  %v4584_v40 = vld [vmem:[#allocation2 + $0x2a8] ss:$16 sps:$4 sm:$0xff]   ;;  %1678 = vmatprep.subr.bf16.mxu1 %v4595_v63 }
  0x98   :  { %1716 = vmatpush1.bf16.msra.mxu0 %v4584_v40 }
  0x99   :  { %1717 = vmatprep.subr.bf16.mxu0 %v4592_v60 }
  0x9a   :  { %1679 = vmatpush1.bf16.msra.mxu1 %v4593_v2 }
  0x9b   :  { %1680 = vmatprep.subr.bf16.mxu1 %v4601_v4 }
  0x9c   :  { %1718 = vmatpush1.bf16.msra.mxu0 %v4590_v62 }
  0x9d   :  { %1719 = vmatprep.subr.bf16.mxu0 %v4598_v1 }
  0x9e   :  { %1681 = vmatpush1.bf16.msra.mxu1 %v4599_v6 }
  0x9f   :  { %1682 = vmatprep.subr.bf16.mxu1 %v4607_v9 }
  0xa0   :  { %1720 = vmatpush1.bf16.msra.mxu0 %v4596_v3 }
  0xa1   :  { %1721 = vmatprep.subr.bf16.mxu0 %v4604_v5 }
  0xa2   :  { %1683 = vmatpush1.bf16.msra.mxu1 %v4605_v8 }
  0xa3   :  { %1684 = vmatprep.subr.bf16.mxu1 %v4613_v12 }
  0xa4   :  { %1722 = vmatpush1.bf16.msra.mxu0 %v4602_v7 }
  0xa5   :  { %1723 = vmatprep.subr.bf16.mxu0 %v4610_v11 }
  0xa6   :  { %1685 = vmatpush1.bf16.msra.mxu1 %v4611_v14 }
  0xa7   :  { %1686 = vmatprep.subr.bf16.mxu1 %v4619_v16 }
  0xa8   :  { %1724 = vmatpush1.bf16.msra.mxu0 %v4608_v10 }
  0xa9   :  { %1725 = vmatprep.subr.bf16.mxu0 %v4616_v13 }
  0xaa   :  { %1687 = vmatpush2.bf16.msra.mxu1 %v4617_v18 }
  0xab   :  { %1688 = vmatprep.subr.bf16.mxu1 %v4625_v20 }
  0xac   :  { %1726 = vmatpush1.bf16.msra.mxu0 %v4614_v15 }
  0xad   :  { %1727 = vmatprep.subr.bf16.mxu0 %v4622_v17 }
  0xae   :  { %1689 = vmatpush2.bf16.msra.mxu1 %v4623_v22 }
  0xaf   :  { %1690 = vmatprep.subr.bf16.mxu1 %v4631_v24 }
  0xb0   :  { %1728 = vmatpush2.bf16.msra.mxu0 %v4620_v19 }
  0xb1   :  { %1729 = vmatprep.subr.bf16.mxu0 %v4628_v21 }
  0xb2   :  { %1691 = vmatpush2.bf16.msra.mxu1 %v4629_v26 }
  0xb3   :  { %1692 = vmatprep.subr.bf16.mxu1 %v4637_v29 }
  0xb4   :  { %1730 = vmatpush2.bf16.msra.mxu0 %v4626_v23 }
  0xb5   :  { %1731 = vmatprep.subr.bf16.mxu0 %v4634_v25 }
  0xb6   :  { %1693 = vmatpush2.bf16.msra.mxu1 %v4635_v28 }
  0xb7   :  { %1694 = vmatprep.subr.bf16.mxu1 %v4643_v33 }
  0xb8   :  { %1732 = vmatpush2.bf16.msra.mxu0 %v4632_v27 }
  0xb9   :  { %1733 = vmatprep.subr.bf16.mxu0 %v4640_v32 }
  0xba   :  { %1695 = vmatpush2.bf16.msra.mxu1 %v4641_v35 }
  0xbb   :  { %1696 = vmatprep.subr.bf16.mxu1 %v4649_v37 }
  0xbc   :  { %1734 = vmatpush2.bf16.msra.mxu0 %v4638_v30 }
  0xbd   :  { %1735 = vmatprep.subr.bf16.mxu0 %v4646_v34 }
  0xbe   :  { %1697 = vmatpush2.bf16.msra.mxu1 %v4647_v39 }
  0xbf   :  { %1698 = vmatprep.subr.bf16.mxu1 %v4655_v42 }
  0xc0   :  { %1736 = vmatpush2.bf16.msra.mxu0 %v4644_v36 }
  0xc1   :  { %1737 = vmatprep.subr.bf16.mxu0 %v4652_v38 }
  0xc2   :  { %1699 = vmatpush2.bf16.msra.mxu1 %v4653_v44 }
  0xc3   :  { %1700 = vmatprep.subr.bf16.mxu1 %v4661_v46 }
  0xc4   :  { %1738 = vmatpush2.bf16.msra.mxu0 %v4650_v41 }
  0xc5   :  { %1739 = vmatprep.subr.bf16.mxu0 %v4658_v43 }
  0xc6   :  { %1701 = vmatpush2.bf16.msra.mxu1 %v4659_v48 }
  0xc7   :  { %2072 = vmatprep.subr.bf16.mxu1 %v4667_v50 }
  0xc8   :  { %1740 = vmatpush2.bf16.msra.mxu0 %v4656_v45 }
  0xc9   :  { %1741 = vmatprep.subr.bf16.mxu0 %v4664_v47 }
  0xcc   :  { %1742 = vmatpush2.bf16.msra.mxu0 %v4662_v49 }
  0xcd   :  { %2113 = vmatprep.subr.bf16.mxu0 %v4670_v51 }
  0xff   :  { %v5543_v52 = vpop.f32.mrf.mxu0 }
 0x100   :  { %v5545_v53 = vpop.f32.mrf.mxu1 }
 0x101   :  { %v5547_v54 = vpop.f32.mrf.mxu0 }
 0x102   :  { %v5549_v55 = vpop.f32.mrf.mxu1 }
 0x103   :  { %v5551_v56 = vpop.f32.mrf.mxu0 }
 0x104   :  { %v5553_v57 = vpop.f32.mrf.mxu1 }
 0x105   :  { %v5555_v0 = vpop.f32.mrf.mxu0 }
 0x106   :  { %v5557_v31 = vpop.f32.mrf.mxu1 }
 0x107   :  { %v5559_v58 = vpop.f32.mrf.mxu0 }
 0x108   :  { %v5561_v40 = vpop.f32.mrf.mxu1 }
 0x109   :  { %v5563_v59 = vpop.f32.mrf.mxu0 }
 0x10a   :  { %v5565_v60 = vpop.f32.mrf.mxu1 }
 0x10b   :  { %v5569_v62 = vpop.f32.mrf.mxu0 }
 0x10c   :  { %v5567_v61 = vpop.f32.mrf.mxu1 }
 0x10d   :  { %v5573_v1 = vpop.f32.mrf.mxu0 }
 0x10e   :  { %v5571_v63 = vpop.f32.mrf.mxu1 }
 0x113   :  { %v5575_v2 = vpop.f32.mrf.mxu0 }
 0x114   :  { %v5577_v3 = vpop.f32.mrf.mxu1 }
 0x115   :  { %v5579_v4 = vpop.f32.mrf.mxu0 }
 0x116   :  { %v5581_v5 = vpop.f32.mrf.mxu1 }
 0x117   :  { %v5583_v6 = vpop.f32.mrf.mxu0 }
 0x118   :  { %v5585_v7 = vpop.f32.mrf.mxu1 }
 0x119   :  { %v5587_v8 = vpop.f32.mrf.mxu0 }
 0x11a   :  { %v5589_v9 = vpop.f32.mrf.mxu1 }
 0x11b   :  { %v5591_v10 = vpop.f32.mrf.mxu0 }
 0x11c   :  { %v845_v11 = vpop.f32.mrf.mxu1 }
 0x11d   :  { %v1131_v12 = vmax.f32 %v5559_v58, %v845_v11  ;;  %v5594_v13 = vpop.f32.mrf.mxu0 }
 0x11e   :  { %v847_v14 = vpop.f32.mrf.mxu1 }
 0x11f   :  { %v1132_v15 = vmax.f32 %v5563_v59, %v847_v14  ;;  %v5598_v18 = vpop.f32.mrf.mxu0 }
 0x120   :  { %v849_v16 = vpop.f32.mrf.mxu1 }
 0x121   :  { %v1137_v17 = vmax.f32 %v5569_v62, %v849_v16  ;;  %v5601_v21 = vpop.f32.mrf.mxu0 }
 0x122   :  { %v851_v19 = vpop.f32.mrf.mxu1 }
 0x123   :  { %v1138_v20 = vmax.f32 %v5573_v1, %v851_v19 }
 0x127   :  { %v888_v22 = vpop.f32.mrf.mxu0 }
 0x128   :  { %v5603_v23 = vpop.f32.mrf.mxu1 }
 0x129   :  { %v5605_v24 = vpop.f32.mrf.mxu0 }
 0x12a   :  { %v5607_v25 = vpop.f32.mrf.mxu1 }
 0x12b   :  { %v5609_v26 = vpop.f32.mrf.mxu0 }
 0x12c   :  { %v5611_v27 = vpop.f32.mrf.mxu1 }
 0x12d   :  { %v5613_v28 = vpop.f32.mrf.mxu0 }
 0x12e   :  { %v5615_v29 = vpop.f32.mrf.mxu1 }
 0x12f   :  { %v898_v30 = vpop.f32.mrf.mxu0 }
 0x130   :  { %v5617_v32 = vpop.f32.mrf.mxu1  ;;  %v1133_v33 = vmax.f32 %v5561_v40, %v898_v30 }
 0x131   :  { %v1135_v34 = vmax.f32 %v5591_v10, %v5617_v32  ;;  %v900_v35 = vpop.f32.mrf.mxu0 }
 0x132   :  { %v5622_v36 = vpop.f32.mrf.mxu1  ;;  %v1134_v37 = vmax.f32 %v5565_v60, %v900_v35 }
 0x133   :  { %v902_v39 = vpop.f32.mrf.mxu0 }
 0x134   :  { %v5627_v41 = vpop.f32.mrf.mxu1  ;;  %v1139_v42 = vmax.f32 %v5567_v61, %v902_v39 }
 0x135   :  { %v904_v44 = vpop.f32.mrf.mxu0 }
 0x136   :  { %v5632_v45 = vpop.f32.mrf.mxu1  ;;  %v1140_v46 = vmax.f32 %v5571_v63, %v904_v44  ;;  %v1185_v44 = vlaneseq }
 0x13b   :  { %v994_v48 = vpop.f32.mrf.mxu0 }
 0x13c   :  { %v1047_v49 = vpop.f32.mrf.mxu1 }
 0x13d   :  { %v996_v50 = vpop.f32.mrf.mxu0 }
 0x13e   :  { %v1049_v51 = vpop.f32.mrf.mxu1 }
 0x13f   :  { %v998_v58 = vpop.f32.mrf.mxu0 }
 0x140   :  { %v1051_v40 = vpop.f32.mrf.mxu1 }
 0x141   :  { %v1000_v59 = vpop.f32.mrf.mxu0 }
 0x142   :  { %v1053_v60 = vpop.f32.mrf.mxu1 }
 0x143   :  { %v1004_v61 = vpop.f32.mrf.mxu0 }
 0x144   :  { %v1057_v62 = vpop.f32.mrf.mxu1  ;;  %v5637_v1 = vmax.f32 %v1131_v12, %v1004_v61 }
 0x145   :  { %v5639_v11 = vmax.f32 %v1133_v33, %v1057_v62  ;;  %v1006_v14 = vpop.f32.mrf.mxu0 }
 0x146   :  { %v1059_v16 = vpop.f32.mrf.mxu1  ;;  %v5643_v19 = vmax.f32 %v1132_v15, %v1006_v14  ;;  %v1121_v14 = vmax.f32 %v5545_v53, %v888_v22  ;;  %v1127_v53 = vmax.f32 %v5553_v57, %v5609_v26 }
 0x147   :  { %v1171_v63 = vmax.f32 %v5637_v1, %v5639_v11  ;;  %v5645_v30 = vmax.f32 %v1134_v37, %v1059_v16  ;;  %v1008_v35 = vpop.f32.mrf.mxu0  ;;  %v1119_v37 = vmax.f32 %v5543_v52, %v5577_v3  ;;  %v5662_v16 = vshrl.u32 %v1185_v44, 7 }
 0x148   :  { %v1061_v39 = vpop.f32.mrf.mxu1  ;;  %v5649_v43 = vmax.f32 %v1137_v17, %v1008_v35  ;;  %v1120_v17 = vmax.f32 %v5547_v54, %v5581_v5  ;;  %v1123_v52 = vmax.f32 %v5575_v2, %v5603_v23  ;;  %v1126_v54 = vmax.f32 %v5555_v0, %v5589_v9  ;;  %v1183_v0 = vld [vmem:[%s5795_s2] sm:$0x3] }
 0x149   :  { %v1172_v47 = vmax.f32 %v5643_v19, %v5645_v30  ;;  %v5651_v12 = vmax.f32 %v1139_v42, %v1061_v39  ;;  %v1010_v33 = vpop.f32.mrf.mxu0  ;;  %v1122_v42 = vmax.f32 %v5549_v55, %v5605_v24  ;;  %v1145_v39 = vmax.f32 %v1121_v14, %v1047_v49  ;;  %v4665_v19 = vld [vmem:[#allocation2 + $0xe0] ss:$16 sps:$4 sm:$0xff]  }
 0x14a   :  { %v1063_v61 = vpop.f32.mrf.mxu1  ;;  %v5655_v38 = vmax.f32 %v1138_v20, %v1010_v33  ;;  %v1125_v20 = vmax.f32 %v5551_v56, %v5585_v7  ;;  %v1144_v3 = vmax.f32 %v1120_v17, %v996_v50  ;;  %v1124_v55 = vmax.f32 %v5579_v4, %v5607_v25 }
 0x14b   :  { %v1173_v62 = vmax.f32 %v5649_v43, %v5651_v12  ;;  %v5657_v15 = vmax.f32 %v1140_v46, %v1063_v61  ;;  %v1143_v46 = vmax.f32 %v1119_v37, %v994_v48  ;;  %v1146_v22 = vmax.f32 %v1122_v42, %v1049_v51 }
 0x14c   :  { %v5681_v24 = vsub.s32 0, %v5662_v16  ;;  %v5684_v56 = vsub.s32 1, %v5662_v16  ;;  %v1128_v2 = vmax.f32 %v5557_v31, %v5613_v28  ;;  %v1149_v7 = vmax.f32 %v1125_v20, %v998_v58 }
 0x14d   :  { %v1174_v35 = vmax.f32 %v5655_v38, %v5657_v15  ;;  %v1151_v57 = vmax.f32 %v1127_v53, %v1051_v40  ;;  %v1129_v4 = vmax.f32 %v5583_v6, %v5611_v27  ;;  %v1167_v9 = vmax.f32 %v1143_v46, %v1145_v39  ;;  %v4679_v38 = vld [vmem:[#allocation2 + $0xa4] ss:$16 sps:$4 sm:$0xff]   ;;  %v4682_v15 = vld [vmem:[#allocation2 + $0xac] ss:$16 sps:$4 sm:$0xff]  }
 0x14e   :  { %v1168_v26 = vmax.f32 %v1144_v3, %v1146_v22  ;;  %v1150_v48 = vmax.f32 %v1126_v54, %v1000_v59  ;;  %v1152_v49 = vmax.f32 %v1128_v2, %v1053_v60  ;;  %v1188_v44 = vrot.slane %v1183_v0, %v5681_v24 }
 0x14f   :  { %v1100_v5 = vpop.f32.mrf.mxu0  ;;  %v1192_v31 = vrot.slane %v1183_v0, %v5684_v56  ;;  %v1130_v58 = vmax.f32 %v5587_v8, %v5615_v29  ;;  %v1169_v40 = vmax.f32 %v1149_v7, %v1151_v57  ;;  %v5805_v29 = vmax.f32 %v5594_v13, %v5622_v36 }
 0x150   :  { %v1147_v23 = vmax.f32 %v1123_v52, %v1100_v5  ;;  %v1170_v6 = vmax.f32 %v1150_v48, %v1152_v49  ;;  %v5807_v36 = vmax.f32 %v5601_v21, %v5632_v45  ;;  %v4671_v21 = vld [vmem:[#allocation2 + $0xc0] ss:$16 sps:$4 sm:$0xff]   ;;  %v4674_v45 = vld [vmem:[#allocation2 + $0xc8] ss:$16 sps:$4 sm:$0xff]  }
 0x151   :  { %v1102_v25 = vpop.f32.mrf.mxu0  ;;  %v4677_v48 = vld [vmem:[#allocation2 + $0xa0] ss:$16 sps:$4 sm:$0xff]   ;;  %v4680_v49 = vld [vmem:[#allocation2 + $0xa8] ss:$16 sps:$4 sm:$0xff]  }
 0x152   :  { %v1148_v50 = vmax.f32 %v1124_v55, %v1102_v25  ;;  %v1175_v51 = vmax.f32 %v1167_v9, %v1147_v23 }
 0x153   :  { %v1104_v28 = vpop.f32.mrf.mxu0 }
 0x154   :  { %v1176_v33 = vmax.f32 %v1168_v26, %v1148_v50  ;;  %v1153_v61 = vmax.f32 %v1129_v4, %v1104_v28  ;;  %v1195_v17 = vadd.f32 %v1188_v44, %v1175_v51  ;;  %v4676_v4 = vld [vmem:[#allocation2 + $0xcc] ss:$16 sps:$4 sm:$0xff]   ;;  %v4685_v50 = vld [vmem:[#allocation2 + $0x84] ss:$16 sps:$4 sm:$0xff]  }
 0x155   :  { %v1106_v37 = vpop.f32.mrf.mxu0  ;;  %v4688_v51 = vld [vmem:[#allocation2 + $0x8c] ss:$16 sps:$4 sm:$0xff]   ;;  %v4691_v28 = vld [vmem:[#allocation2 + $0x64] ss:$16 sps:$4 sm:$0xff]  }
 0x156   :  { %v1177_v27 = vmax.f32 %v1169_v40, %v1153_v61  ;;  %v1154_v14 = vmax.f32 %v1130_v58, %v1106_v37  ;;  %v1196_v60 = vadd.f32 %v1192_v31, %v1176_v33  ;;  %v1203_v22 = vmax.f32 %v1195_v17, 0.0  ;;  %v4694_v58 = vld [vmem:[#allocation2 + $0x6c] ss:$16 sps:$4 sm:$0xff]   ;;  %v4689_v40 = vld [vmem:[#allocation2 + $0x60] ss:$16 sps:$4 sm:$0xff]  }
 0x157   :  { %v1110_v59 = vpop.f32.mrf.mxu0  ;;  %v4692_v33 = vld [vmem:[#allocation2 + $0x68] ss:$16 sps:$4 sm:$0xff]   ;;  %v4697_v61 = vld [vmem:[#allocation2 + $0x44] ss:$16 sps:$4 sm:$0xff]   ;;  %v4700_v37 = vld [vmem:[#allocation2 + $0x4c] ss:$16 sps:$4 sm:$0xff]  }
 0x158   :  { %v1197_v42 = vadd.f32 %v1188_v44, %v1177_v27  ;;  %v1178_v20 = vmax.f32 %v1170_v6, %v1154_v14  ;;  %v1159_v46 = vmax.f32 %v1135_v34, %v1110_v59  ;;  %v1204_v55 = vmax.f32 %v1196_v60, 0.0  ;;  %v4695_v6 = vld [vmem:[#allocation2 + $0x40] ss:$16 sps:$4 sm:$0xff]   ;;  %v4698_v27 = vld [vmem:[#allocation2 + $0x48] ss:$16 sps:$4 sm:$0xff]  }
 0x159   :  { %v1112_v39 = vpop.f32.mrf.mxu0  ;;  %v5806_v34 = vmax.f32 %v5598_v18, %v5627_v41  ;;  %v4673_v41 = vld [vmem:[#allocation2 + $0xc4] ss:$16 sps:$4 sm:$0xff]   ;;  %v4706_v17 = vld [vmem:[#allocation2 + $0x2c] ss:$16 sps:$4 sm:$0xff]   ;;  %v4701_v59 = vld [vmem:[#allocation2 + $0x20] ss:$16 sps:$4 sm:$0xff]  }
 0x15a   :  { %v1205_v52 = vmax.f32 %v1197_v42, 0.0  ;;  %v1198_v53 = vadd.f32 %v1192_v31, %v1178_v20  ;;  %v1179_v8 = vmax.f32 %v1171_v63, %v1159_v46  ;;  %v1160_v3 = vmax.f32 %v5805_v29, %v1112_v39  ;;  %v4703_v14 = vld [vmem:[#allocation2 + $0x24] ss:$16 sps:$4 sm:$0xff]   ;;  %v4704_v60 = vld [vmem:[#allocation2 + $0x28] ss:$16 sps:$4 sm:$0xff]  }
 0x15b   :  { %v1114_v54 = vpop.f32.mrf.mxu0  ;;  %v4709_v42 = vld [vmem:[#allocation2 + $0x4] ss:$16 sps:$4 sm:$0xff]   ;;  %v4712_v20 = vld [vmem:[#allocation2 + $0xc] ss:$16 sps:$4 sm:$0xff]   ;;  %v4707_v46 = vld [vmem:[#allocation2] ss:$16 sps:$4 sm:$0xff]  }
 0x15c   :  { %v1206_v5 = vmax.f32 %v1198_v53, 0.0  ;;  %v1199_v2 = vadd.f32 %v1188_v44, %v1179_v8  ;;  %v1180_v10 = vmax.f32 %v1172_v47, %v1160_v3  ;;  %v5709_v32 = vpack.c.bf16 %v1205_v52, %v1203_v22  ;;  %v4668_v47 = vld [vmem:[#allocation2 + $0xe8] ss:$16 sps:$4 sm:$0xff]   ;;  %v4715_v52 = vld [vmem:[#allocation2 + $0x1e4] ss:$16 sps:$4 sm:$0xff]  }
 0x15d   :  { %v1165_v1 = vmax.f32 %v5806_v34, %v1114_v54  ;;  %v1116_v11 = vpop.f32.mrf.mxu0  ;;  %v4710_v39 = vld [vmem:[#allocation2 + $0x8] ss:$16 sps:$4 sm:$0xff]   ;;  %v4718_v53 = vld [vmem:[#allocation2 + $0x1ec] ss:$16 sps:$4 sm:$0xff]   ;;  %v4713_v8 = vld [vmem:[#allocation2 + $0x1e0] ss:$16 sps:$4 sm:$0xff]  }
 0x15e   :  { %v1212_v63 = vpack.c.bf16 %v1206_v5, %v1204_v55  ;;  %v1200_v7 = vadd.f32 %v1192_v31, %v1180_v10  ;;  %v1166_v57 = vmax.f32 %v5807_v36, %v1116_v11  ;;  %v1346_v30 = vrot.slane %v5709_v32, 4  ;;  %v4716_v29 = vld [vmem:[#allocation2 + $0x1e8] ss:$16 sps:$4 sm:$0xff]   ;;  %v4721_v3 = vld [vmem:[#allocation2 + $0x1c4] ss:$16 sps:$4 sm:$0xff]  }
 0x15f   :  { %v1181_v13 = vmax.f32 %v1173_v62, %v1165_v1  ;;  %v1207_v43 = vmax.f32 %v1199_v2, 0.0  ;;  %v4724_v22 = vld [vmem:[#allocation2 + $0x1cc] ss:$16 sps:$4 sm:$0xff]   ;;  %v4719_v54 = vld [vmem:[#allocation2 + $0x1c0] ss:$16 sps:$4 sm:$0xff]  }
 0x160   :  { %v1347_v23 = vrot.slane %v1212_v63, 4  ;;  %v1182_v18 = vmax.f32 %v1174_v35, %v1166_v57  ;;  %v1208_v9 = vmax.f32 %v1200_v7, 0.0  ;;  %v4722_v55 = vld [vmem:[#allocation2 + $0x1c8] ss:$16 sps:$4 sm:$0xff]   ;;  %v4727_v5 = vld [vmem:[#allocation2 + $0x1a4] ss:$16 sps:$4 sm:$0xff]  }
 0x161   :  { %v1201_v0 = vadd.f32 %v1188_v44, %v1181_v13  ;;  %v4683_v44 = vld [vmem:[#allocation2 + $0x80] ss:$16 sps:$4 sm:$0xff]   ;;  %v4730_v2 = vld [vmem:[#allocation2 + $0x1ac] ss:$16 sps:$4 sm:$0xff]   ;;  %v4728_v34 = vld [vmem:[#allocation2 + $0x1a8] ss:$16 sps:$4 sm:$0xff]  }
 0x162   :  { %1702 = vmatprep.mubr.bf16.mxu1 %v1347_v23  ;;  %1743 = vmatprep.mubr.bf16.mxu0 %v1347_v23  ;;  %v1202_v62 = vadd.f32 %v1192_v31, %v1182_v18  ;;  %v4686_v31 = vld [vmem:[#allocation2 + $0x88] ss:$16 sps:$4 sm:$0xff]   ;;  %v4725_v10 = vld [vmem:[#allocation2 + $0x1a0] ss:$16 sps:$4 sm:$0xff]   ;;  %v4733_v1 = vld [vmem:[#allocation2 + $0x184] ss:$16 sps:$4 sm:$0xff]  }
 0x163   :  { %v1209_v12 = vmax.f32 %v1201_v0, 0.0  ;;  %1703 = vmatmul.mubr.bf16.vlgmr.msra.gmra.mxu1 %v1346_v30  ;;  %1744 = vmatmul.mubr.bf16.vlgmr.msra.gmra.mxu0 %v1346_v30  ;;  %v4736_v11 = vld [vmem:[#allocation2 + $0x18c] ss:$16 sps:$4 sm:$0xff]   ;;  %v4734_v7 = vld [vmem:[#allocation2 + $0x188] ss:$16 sps:$4 sm:$0xff]  }
 0x164   :  { %2073 = vmatpush1.bf16.msra.mxu1 %v4665_v19  ;;  %2114 = vmatpush1.bf16.msra.mxu0 %v4668_v47  ;;  %v1210_v26 = vmax.f32 %v1202_v62, 0.0  ;;  %v4739_v13 = vld [vmem:[#allocation2 + $0x164] ss:$16 sps:$4 sm:$0xff]   ;;  %v4742_v36 = vld [vmem:[#allocation2 + $0x16c] ss:$16 sps:$4 sm:$0xff]  }
 0x165   :  { %v5724_v25 = vpack.c.bf16 %v1209_v12, %v1207_v43  ;;  %2104 = vmatprep.mubr.bf16.mxu1 %v1212_v63  ;;  %2145 = vmatprep.mubr.bf16.mxu0 %v1212_v63  ;;  %v4731_v63 = vld [vmem:[#allocation2 + $0x180] ss:$16 sps:$4 sm:$0xff]   ;;  %v4740_v23 = vld [vmem:[#allocation2 + $0x168] ss:$16 sps:$4 sm:$0xff]   ;;  %v4745_v19 = vld [vmem:[#allocation2 + $0x144] ss:$16 sps:$4 sm:$0xff]  }
 0x166   :  { %2074 = vmatprep.subr.bf16.mxu1 %v4673_v41  ;;  %2115 = vmatprep.subr.bf16.mxu0 %v4676_v4  ;;  %v5726_v35 = vpack.c.bf16 %v1210_v26, %v1208_v9  ;;  %v4737_v57 = vld [vmem:[#allocation2 + $0x160] ss:$16 sps:$4 sm:$0xff]   ;;  %v4748_v47 = vld [vmem:[#allocation2 + $0x14c] ss:$16 sps:$4 sm:$0xff]   ;;  %v4746_v0 = vld [vmem:[#allocation2 + $0x148] ss:$16 sps:$4 sm:$0xff]  }
 0x167   :  { %v4743_v30 = vld [vmem:[#allocation2 + $0x140] ss:$16 sps:$4 sm:$0xff]   ;;  %v4751_v18 = vld [vmem:[#allocation2 + $0x124] ss:$16 sps:$4 sm:$0xff]   ;;  %v4754_v41 = vld [vmem:[#allocation2 + $0x12c] ss:$16 sps:$4 sm:$0xff]  }
 0x168   :  { %2075 = vmatpush1.bf16.msra.mxu1 %v4671_v21  ;;  %2116 = vmatpush1.bf16.msra.mxu0 %v4674_v45  ;;  %v4749_v4 = vld [vmem:[#allocation2 + $0x120] ss:$16 sps:$4 sm:$0xff]   ;;  %v4752_v43 = vld [vmem:[#allocation2 + $0x128] ss:$16 sps:$4 sm:$0xff]   ;;  %v4757_v12 = vld [vmem:[#allocation2 + $0x104] ss:$16 sps:$4 sm:$0xff]  }
 0x169   :  { %2076 = vmatprep.subr.bf16.mxu1 %v4679_v38  ;;  %2117 = vmatprep.subr.bf16.mxu0 %v4682_v15  ;;  %v4760_v62 = vld [vmem:[#allocation2 + $0x10c] ss:$16 sps:$4 sm:$0xff]   ;;  %v4755_v21 = vld [vmem:[#allocation2 + $0x100] ss:$16 sps:$4 sm:$0xff]   ;;  %v4758_v45 = vld [vmem:[#allocation2 + $0x108] ss:$16 sps:$4 sm:$0xff]  }
 0x16a   :  { %v4763_v9 = vld [vmem:[#allocation2 + $0x4e4] ss:$16 sps:$4 sm:$0xff]   ;;  %v4766_v26 = vld [vmem:[#allocation2 + $0x4ec] ss:$16 sps:$4 sm:$0xff]   ;;  %v4761_v38 = vld [vmem:[#allocation2 + $0x4e0] ss:$16 sps:$4 sm:$0xff]  }
 0x16b   :  { %v4764_v15 = vld [vmem:[#allocation2 + $0x4e8] ss:$16 sps:$4 sm:$0xff]  }
 0x16c   :  { %2077 = vmatpush1.bf16.msra.mxu1 %v4677_v48  ;;  %2118 = vmatpush1.bf16.msra.mxu0 %v4680_v49  ;;  %v4769_v48 = vld [vmem:[#allocation2 + $0x4c4] ss:$16 sps:$4 sm:$0xff]   ;;  %v4772_v49 = vld [vmem:[#allocation2 + $0x4cc] ss:$16 sps:$4 sm:$0xff]  }
 0x16d   :  { %2078 = vmatprep.subr.bf16.mxu1 %v4685_v50  ;;  %2119 = vmatprep.subr.bf16.mxu0 %v4688_v51  ;;  %v4767_v50 = vld [vmem:[#allocation2 + $0x4c0] ss:$16 sps:$4 sm:$0xff]   ;;  %v4770_v51 = vld [vmem:[#allocation2 + $0x4c8] ss:$16 sps:$4 sm:$0xff]  }
 0x170   :  { %2079 = vmatpush1.bf16.msra.mxu1 %v4683_v44  ;;  %2120 = vmatpush1.bf16.msra.mxu0 %v4686_v31  ;;  %v4775_v44 = vld [vmem:[#allocation2 + $0x4a4] ss:$16 sps:$4 sm:$0xff]   ;;  %v4778_v31 = vld [vmem:[#allocation2 + $0x4ac] ss:$16 sps:$4 sm:$0xff]  }
 0x171   :  { %2080 = vmatprep.subr.bf16.mxu1 %v4691_v28  ;;  %2121 = vmatprep.subr.bf16.mxu0 %v4694_v58  ;;  %v4773_v28 = vld [vmem:[#allocation2 + $0x4a0] ss:$16 sps:$4 sm:$0xff]   ;;  %v4776_v58 = vld [vmem:[#allocation2 + $0x4a8] ss:$16 sps:$4 sm:$0xff]  }
 0x174   :  { %2081 = vmatpush1.bf16.msra.mxu1 %v4689_v40  ;;  %2122 = vmatpush1.bf16.msra.mxu0 %v4692_v33  ;;  %v4781_v40 = vld [vmem:[#allocation2 + $0x484] ss:$16 sps:$4 sm:$0xff]   ;;  %v4779_v33 = vld [vmem:[#allocation2 + $0x480] ss:$16 sps:$4 sm:$0xff]  }
 0x175   :  { %2082 = vmatprep.subr.bf16.mxu1 %v4697_v61  ;;  %2123 = vmatprep.subr.bf16.mxu0 %v4700_v37  ;;  %v4782_v61 = vld [vmem:[#allocation2 + $0x488] ss:$16 sps:$4 sm:$0xff]   ;;  %v4787_v37 = vld [vmem:[#allocation2 + $0x464] ss:$16 sps:$4 sm:$0xff]  }
 0x178   :  { %2083 = vmatpush1.bf16.msra.mxu1 %v4695_v6  ;;  %2124 = vmatpush1.bf16.msra.mxu0 %v4698_v27  ;;  %v4790_v6 = vld [vmem:[#allocation2 + $0x46c] ss:$16 sps:$4 sm:$0xff]   ;;  %v4785_v27 = vld [vmem:[#allocation2 + $0x460] ss:$16 sps:$4 sm:$0xff]  }
 0x179   :  { %2084 = vmatprep.subr.bf16.mxu1 %v4703_v14  ;;  %2125 = vmatprep.subr.bf16.mxu0 %v4706_v17  ;;  %v4788_v14 = vld [vmem:[#allocation2 + $0x468] ss:$16 sps:$4 sm:$0xff]   ;;  %v4793_v17 = vld [vmem:[#allocation2 + $0x444] ss:$16 sps:$4 sm:$0xff]  }
 0x17c   :  { %2085 = vmatpush1.bf16.msra.mxu1 %v4701_v59  ;;  %2126 = vmatpush1.bf16.msra.mxu0 %v4704_v60  ;;  %v4796_v59 = vld [vmem:[#allocation2 + $0x44c] ss:$16 sps:$4 sm:$0xff]   ;;  %v4791_v60 = vld [vmem:[#allocation2 + $0x440] ss:$16 sps:$4 sm:$0xff]  }
 0x17d   :  { %2086 = vmatprep.subr.bf16.mxu1 %v4709_v42  ;;  %2127 = vmatprep.subr.bf16.mxu0 %v4712_v20  ;;  %v4794_v42 = vld [vmem:[#allocation2 + $0x448] ss:$16 sps:$4 sm:$0xff]   ;;  %v4799_v20 = vld [vmem:[#allocation2 + $0x424] ss:$16 sps:$4 sm:$0xff]  }
 0x180   :  { %2087 = vmatpush1.bf16.msra.mxu1 %v4707_v46  ;;  %2128 = vmatpush1.bf16.msra.mxu0 %v4710_v39  ;;  %v4802_v46 = vld [vmem:[#allocation2 + $0x42c] ss:$16 sps:$4 sm:$0xff]   ;;  %v4797_v39 = vld [vmem:[#allocation2 + $0x420] ss:$16 sps:$4 sm:$0xff]  }
 0x181   :  { %2088 = vmatprep.subr.bf16.mxu1 %v4715_v52  ;;  %2129 = vmatprep.subr.bf16.mxu0 %v4718_v53  ;;  %v4800_v52 = vld [vmem:[#allocation2 + $0x428] ss:$16 sps:$4 sm:$0xff]   ;;  %v4805_v53 = vld [vmem:[#allocation2 + $0x404] ss:$16 sps:$4 sm:$0xff]  }
 0x184   :  { %2089 = vmatpush2.bf16.msra.mxu1 %v4713_v8  ;;  %2130 = vmatpush2.bf16.msra.mxu0 %v4716_v29  ;;  %v4808_v8 = vld [vmem:[#allocation2 + $0x40c] ss:$16 sps:$4 sm:$0xff]   ;;  %v4803_v29 = vld [vmem:[#allocation2 + $0x400] ss:$16 sps:$4 sm:$0xff]  }
 0x185   :  { %2090 = vmatprep.subr.bf16.mxu1 %v4721_v3  ;;  %2131 = vmatprep.subr.bf16.mxu0 %v4724_v22  ;;  %v4806_v3 = vld [vmem:[#allocation2 + $0x408] ss:$16 sps:$4 sm:$0xff]   ;;  %v4811_v22 = vld [vmem:[#allocation2 + $0x5e4] ss:$16 sps:$4 sm:$0xff]  }
 0x188   :  { %2091 = vmatpush2.bf16.msra.mxu1 %v4719_v54  ;;  %2132 = vmatpush2.bf16.msra.mxu0 %v4722_v55  ;;  %v4814_v54 = vld [vmem:[#allocation2 + $0x5ec] ss:$16 sps:$4 sm:$0xff]   ;;  %v4809_v55 = vld [vmem:[#allocation2 + $0x5e0] ss:$16 sps:$4 sm:$0xff]  }
 0x189   :  { %2092 = vmatprep.subr.bf16.mxu1 %v4727_v5  ;;  %2133 = vmatprep.subr.bf16.mxu0 %v4730_v2  ;;  %v4812_v5 = vld [vmem:[#allocation2 + $0x5e8] ss:$16 sps:$4 sm:$0xff]   ;;  %v4817_v2 = vld [vmem:[#allocation2 + $0x5c4] ss:$16 sps:$4 sm:$0xff]  }
 0x18c   :  { %2093 = vmatpush2.bf16.msra.mxu1 %v4725_v10  ;;  %2134 = vmatpush2.bf16.msra.mxu0 %v4728_v34  ;;  %v4820_v10 = vld [vmem:[#allocation2 + $0x5cc] ss:$16 sps:$4 sm:$0xff]   ;;  %v4815_v34 = vld [vmem:[#allocation2 + $0x5c0] ss:$16 sps:$4 sm:$0xff]  }
 0x18d   :  { %2094 = vmatprep.subr.bf16.mxu1 %v4733_v1  ;;  %2135 = vmatprep.subr.bf16.mxu0 %v4736_v11  ;;  %v4818_v1 = vld [vmem:[#allocation2 + $0x5c8] ss:$16 sps:$4 sm:$0xff]   ;;  %v4823_v11 = vld [vmem:[#allocation2 + $0x5a4] ss:$16 sps:$4 sm:$0xff]  }
 0x190   :  { %2095 = vmatpush2.bf16.msra.mxu1 %v4731_v63  ;;  %2136 = vmatpush2.bf16.msra.mxu0 %v4734_v7  ;;  %v4826_v63 = vld [vmem:[#allocation2 + $0x5ac] ss:$16 sps:$4 sm:$0xff]   ;;  %v4821_v7 = vld [vmem:[#allocation2 + $0x5a0] ss:$16 sps:$4 sm:$0xff]  }
 0x191   :  { %2096 = vmatprep.subr.bf16.mxu1 %v4739_v13  ;;  %2137 = vmatprep.subr.bf16.mxu0 %v4742_v36  ;;  %v4824_v13 = vld [vmem:[#allocation2 + $0x5a8] ss:$16 sps:$4 sm:$0xff]   ;;  %v4829_v36 = vld [vmem:[#allocation2 + $0x584] ss:$16 sps:$4 sm:$0xff]  }
 0x194   :  { %2097 = vmatpush2.bf16.msra.mxu1 %v4737_v57  ;;  %2138 = vmatpush2.bf16.msra.mxu0 %v4740_v23  ;;  %v4832_v57 = vld [vmem:[#allocation2 + $0x58c] ss:$16 sps:$4 sm:$0xff]   ;;  %v4827_v23 = vld [vmem:[#allocation2 + $0x580] ss:$16 sps:$4 sm:$0xff]  }
 0x195   :  { %2098 = vmatprep.subr.bf16.mxu1 %v4745_v19  ;;  %2139 = vmatprep.subr.bf16.mxu0 %v4748_v47  ;;  %v4830_v19 = vld [vmem:[#allocation2 + $0x588] ss:$16 sps:$4 sm:$0xff]   ;;  %v4835_v47 = vld [vmem:[#allocation2 + $0x564] ss:$16 sps:$4 sm:$0xff]  }
 0x198   :  { %2099 = vmatpush2.bf16.msra.mxu1 %v4743_v30  ;;  %2140 = vmatpush2.bf16.msra.mxu0 %v4746_v0  ;;  %v4838_v30 = vld [vmem:[#allocation2 + $0x56c] ss:$16 sps:$4 sm:$0xff]   ;;  %v4833_v0 = vld [vmem:[#allocation2 + $0x560] ss:$16 sps:$4 sm:$0xff]  }
 0x199   :  { %2100 = vmatprep.subr.bf16.mxu1 %v4751_v18  ;;  %2141 = vmatprep.subr.bf16.mxu0 %v4754_v41  ;;  %v4836_v18 = vld [vmem:[#allocation2 + $0x568] ss:$16 sps:$4 sm:$0xff]   ;;  %v4841_v41 = vld [vmem:[#allocation2 + $0x544] ss:$16 sps:$4 sm:$0xff]  }
 0x19c   :  { %2101 = vmatpush2.bf16.msra.mxu1 %v4749_v4  ;;  %2142 = vmatpush2.bf16.msra.mxu0 %v4752_v43  ;;  %v4844_v4 = vld [vmem:[#allocation2 + $0x54c] ss:$16 sps:$4 sm:$0xff]   ;;  %v4839_v43 = vld [vmem:[#allocation2 + $0x540] ss:$16 sps:$4 sm:$0xff]  }
 0x19d   :  { %2102 = vmatprep.subr.bf16.mxu1 %v4757_v12  ;;  %2143 = vmatprep.subr.bf16.mxu0 %v4760_v62  ;;  %v4842_v12 = vld [vmem:[#allocation2 + $0x548] ss:$16 sps:$4 sm:$0xff]   ;;  %v4847_v62 = vld [vmem:[#allocation2 + $0x524] ss:$16 sps:$4 sm:$0xff]  }
 0x1a0   :  { %2103 = vmatpush2.bf16.msra.mxu1 %v4755_v21  ;;  %2144 = vmatpush2.bf16.msra.mxu0 %v4758_v45  ;;  %v4850_v21 = vld [vmem:[#allocation2 + $0x52c] ss:$16 sps:$4 sm:$0xff]   ;;  %v4845_v45 = vld [vmem:[#allocation2 + $0x520] ss:$16 sps:$4 sm:$0xff]  }
 0x1a1   :  { %2539 = vmatprep.subr.bf16.mxu1 %v4763_v9  ;;  %2580 = vmatprep.subr.bf16.mxu0 %v4766_v26  ;;  %v4848_v9 = vld [vmem:[#allocation2 + $0x528] ss:$16 sps:$4 sm:$0xff]   ;;  %v4853_v26 = vld [vmem:[#allocation2 + $0x504] ss:$16 sps:$4 sm:$0xff]  }
 0x1a3   :  { %2105 = vmatmul.mubr.bf16.vlgmr.msra.gmra.mxu1 %v5709_v32  ;;  %2146 = vmatmul.mubr.bf16.vlgmr.msra.gmra.mxu0 %v5709_v32  ;;  %v4784_v32 = vld [vmem:[#allocation2 + $0x48c] ss:$16 sps:$4 sm:$0xff]  }
 0x1a4   :  { %2540 = vmatpush1.bf16.msra.mxu1 %v4761_v38  ;;  %2571 = vmatprep.mubr.bf16.mxu1 %v5726_v35  ;;  %v4856_v38 = vld [vmem:[#allocation2 + $0x50c] ss:$16 sps:$4 sm:$0xff]  }
 0x1a5   :  { %2581 = vmatpush1.bf16.msra.mxu0 %v4764_v15  ;;  %2612 = vmatprep.mubr.bf16.mxu0 %v5726_v35  ;;  %v4851_v15 = vld [vmem:[#allocation2 + $0x500] ss:$16 sps:$4 sm:$0xff]  }
 0x1a6   :  { %2541 = vmatprep.subr.bf16.mxu1 %v4769_v48  ;;  %2582 = vmatprep.subr.bf16.mxu0 %v4772_v49  ;;  %v4854_v48 = vld [vmem:[#allocation2 + $0x508] ss:$16 sps:$4 sm:$0xff]   ;;  %v4859_v49 = vld [vmem:[#allocation2 + $0x6e4] ss:$16 sps:$4 sm:$0xff]  }
 0x1a8   :  { %2542 = vmatpush1.bf16.msra.mxu1 %v4767_v50  ;;  %v4862_v50 = vld [vmem:[#allocation2 + $0x6ec] ss:$16 sps:$4 sm:$0xff]  }
 0x1a9   :  { %2583 = vmatpush1.bf16.msra.mxu0 %v4770_v51  ;;  %2543 = vmatprep.subr.bf16.mxu1 %v4775_v44  ;;  %v4857_v51 = vld [vmem:[#allocation2 + $0x6e0] ss:$16 sps:$4 sm:$0xff]   ;;  %v4860_v44 = vld [vmem:[#allocation2 + $0x6e8] ss:$16 sps:$4 sm:$0xff]  }
 0x1aa   :  { %2584 = vmatprep.subr.bf16.mxu0 %v4778_v31  ;;  %v4865_v31 = vld [vmem:[#allocation2 + $0x6c4] ss:$16 sps:$4 sm:$0xff]  }
 0x1ac   :  { %2544 = vmatpush1.bf16.msra.mxu1 %v4773_v28  ;;  %v2693_v28 = vrot.slane %v5726_v35, 4  ;;  %v4880_v35 = vld [vmem:[#allocation2 + $0x68c] ss:$16 sps:$4 sm:$0xff]  }
 0x1ad   :  { %2585 = vmatpush1.bf16.msra.mxu0 %v4776_v58  ;;  %2545 = vmatprep.subr.bf16.mxu1 %v4781_v40  ;;  %v4868_v58 = vld [vmem:[#allocation2 + $0x6cc] ss:$16 sps:$4 sm:$0xff]   ;;  %v4863_v40 = vld [vmem:[#allocation2 + $0x6c0] ss:$16 sps:$4 sm:$0xff]  }
 0x1ae   :  { %2586 = vmatprep.subr.bf16.mxu0 %v4784_v32  ;;  %v4866_v32 = vld [vmem:[#allocation2 + $0x6c8] ss:$16 sps:$4 sm:$0xff]  }
 0x1b0   :  { %2546 = vmatpush1.bf16.msra.mxu1 %v4779_v33  ;;  %v4871_v33 = vld [vmem:[#allocation2 + $0x6a4] ss:$16 sps:$4 sm:$0xff]  }
 0x1b1   :  { %2587 = vmatpush1.bf16.msra.mxu0 %v4782_v61  ;;  %2547 = vmatprep.subr.bf16.mxu1 %v4787_v37  ;;  %v4874_v61 = vld [vmem:[#allocation2 + $0x6ac] ss:$16 sps:$4 sm:$0xff]   ;;  %v4869_v37 = vld [vmem:[#allocation2 + $0x6a0] ss:$16 sps:$4 sm:$0xff]  }
 0x1b2   :  { %2588 = vmatprep.subr.bf16.mxu0 %v4790_v6  ;;  %v4872_v6 = vld [vmem:[#allocation2 + $0x6a8] ss:$16 sps:$4 sm:$0xff]  }
 0x1b4   :  { %2548 = vmatpush1.bf16.msra.mxu1 %v4785_v27  ;;  %v4877_v27 = vld [vmem:[#allocation2 + $0x684] ss:$16 sps:$4 sm:$0xff]  }
 0x1b5   :  { %2589 = vmatpush1.bf16.msra.mxu0 %v4788_v14  ;;  %2549 = vmatprep.subr.bf16.mxu1 %v4793_v17  ;;  %v4875_v14 = vld [vmem:[#allocation2 + $0x680] ss:$16 sps:$4 sm:$0xff]   ;;  %v4878_v17 = vld [vmem:[#allocation2 + $0x688] ss:$16 sps:$4 sm:$0xff]  }
 0x1b6   :  { %2590 = vmatprep.subr.bf16.mxu0 %v4796_v59  ;;  %v4883_v59 = vld [vmem:[#allocation2 + $0x664] ss:$16 sps:$4 sm:$0xff]  }
 0x1b8   :  { %2550 = vmatpush1.bf16.msra.mxu1 %v4791_v60  ;;  %v4886_v60 = vld [vmem:[#allocation2 + $0x66c] ss:$16 sps:$4 sm:$0xff]  }
 0x1b9   :  { %2591 = vmatpush1.bf16.msra.mxu0 %v4794_v42  ;;  %2551 = vmatprep.subr.bf16.mxu1 %v4799_v20  ;;  %v4881_v42 = vld [vmem:[#allocation2 + $0x660] ss:$16 sps:$4 sm:$0xff]   ;;  %v4884_v20 = vld [vmem:[#allocation2 + $0x668] ss:$16 sps:$4 sm:$0xff]  }
 0x1ba   :  { %2592 = vmatprep.subr.bf16.mxu0 %v4802_v46  ;;  %v4889_v46 = vld [vmem:[#allocation2 + $0x644] ss:$16 sps:$4 sm:$0xff]  }
 0x1bc   :  { %2552 = vmatpush1.bf16.msra.mxu1 %v4797_v39  ;;  %v4892_v39 = vld [vmem:[#allocation2 + $0x64c] ss:$16 sps:$4 sm:$0xff]  }
 0x1bd   :  { %2593 = vmatpush1.bf16.msra.mxu0 %v4800_v52  ;;  %2553 = vmatprep.subr.bf16.mxu1 %v4805_v53  ;;  %v4887_v52 = vld [vmem:[#allocation2 + $0x640] ss:$16 sps:$4 sm:$0xff]   ;;  %v4890_v53 = vld [vmem:[#allocation2 + $0x648] ss:$16 sps:$4 sm:$0xff]  }
 0x1be   :  { %2594 = vmatprep.subr.bf16.mxu0 %v4808_v8  ;;  %v4895_v8 = vld [vmem:[#allocation2 + $0x624] ss:$16 sps:$4 sm:$0xff]  }
 0x1c0   :  { %2554 = vmatpush1.bf16.msra.mxu1 %v4803_v29  ;;  %v4898_v29 = vld [vmem:[#allocation2 + $0x62c] ss:$16 sps:$4 sm:$0xff]  }
 0x1c1   :  { %2595 = vmatpush1.bf16.msra.mxu0 %v4806_v3  ;;  %2555 = vmatprep.subr.bf16.mxu1 %v4811_v22  ;;  %v4893_v3 = vld [vmem:[#allocation2 + $0x620] ss:$16 sps:$4 sm:$0xff]   ;;  %v4896_v22 = vld [vmem:[#allocation2 + $0x628] ss:$16 sps:$4 sm:$0xff]  }
 0x1c2   :  { %2596 = vmatprep.subr.bf16.mxu0 %v4814_v54  ;;  %v4901_v54 = vld [vmem:[#allocation2 + $0x604] ss:$16 sps:$4 sm:$0xff]  }
 0x1c4   :  { %2556 = vmatpush2.bf16.msra.mxu1 %v4809_v55  ;;  %v4904_v55 = vld [vmem:[#allocation2 + $0x60c] ss:$16 sps:$4 sm:$0xff]  }
 0x1c5   :  { %2597 = vmatpush2.bf16.msra.mxu0 %v4812_v5  ;;  %2557 = vmatprep.subr.bf16.mxu1 %v4817_v2  ;;  %v4899_v5 = vld [vmem:[#allocation2 + $0x600] ss:$16 sps:$4 sm:$0xff]   ;;  %v4902_v2 = vld [vmem:[#allocation2 + $0x608] ss:$16 sps:$4 sm:$0xff]  }
 0x1c6   :  { %2598 = vmatprep.subr.bf16.mxu0 %v4820_v10  ;;  %v4907_v10 = vld [vmem:[#allocation2 + $0x7e4] ss:$16 sps:$4 sm:$0xff]  }
 0x1c8   :  { %2558 = vmatpush2.bf16.msra.mxu1 %v4815_v34  ;;  %v4910_v34 = vld [vmem:[#allocation2 + $0x7ec] ss:$16 sps:$4 sm:$0xff]  }
 0x1c9   :  { %2599 = vmatpush2.bf16.msra.mxu0 %v4818_v1  ;;  %2559 = vmatprep.subr.bf16.mxu1 %v4823_v11  ;;  %v4905_v1 = vld [vmem:[#allocation2 + $0x7e0] ss:$16 sps:$4 sm:$0xff]   ;;  %v4908_v11 = vld [vmem:[#allocation2 + $0x7e8] ss:$16 sps:$4 sm:$0xff]  }
 0x1ca   :  { %2600 = vmatprep.subr.bf16.mxu0 %v4826_v63  ;;  %v4913_v63 = vld [vmem:[#allocation2 + $0x7c4] ss:$16 sps:$4 sm:$0xff]  }
 0x1cc   :  { %2560 = vmatpush2.bf16.msra.mxu1 %v4821_v7  ;;  %v4916_v7 = vld [vmem:[#allocation2 + $0x7cc] ss:$16 sps:$4 sm:$0xff]  }
 0x1cd   :  { %2601 = vmatpush2.bf16.msra.mxu0 %v4824_v13  ;;  %2561 = vmatprep.subr.bf16.mxu1 %v4829_v36  ;;  %v4911_v13 = vld [vmem:[#allocation2 + $0x7c0] ss:$16 sps:$4 sm:$0xff]   ;;  %v4914_v36 = vld [vmem:[#allocation2 + $0x7c8] ss:$16 sps:$4 sm:$0xff]  }
 0x1ce   :  { %2602 = vmatprep.subr.bf16.mxu0 %v4832_v57  ;;  %v4919_v57 = vld [vmem:[#allocation2 + $0x7a4] ss:$16 sps:$4 sm:$0xff]  }
 0x1d0   :  { %2562 = vmatpush2.bf16.msra.mxu1 %v4827_v23  ;;  %v4922_v23 = vld [vmem:[#allocation2 + $0x7ac] ss:$16 sps:$4 sm:$0xff]  }
 0x1d1   :  { %2603 = vmatpush2.bf16.msra.mxu0 %v4830_v19  ;;  %2563 = vmatprep.subr.bf16.mxu1 %v4835_v47  ;;  %v4917_v19 = vld [vmem:[#allocation2 + $0x7a0] ss:$16 sps:$4 sm:$0xff]   ;;  %v4920_v47 = vld [vmem:[#allocation2 + $0x7a8] ss:$16 sps:$4 sm:$0xff]  }
 0x1d2   :  { %2604 = vmatprep.subr.bf16.mxu0 %v4838_v30  ;;  %v4925_v30 = vld [vmem:[#allocation2 + $0x784] ss:$16 sps:$4 sm:$0xff]  }
 0x1d4   :  { %2564 = vmatpush2.bf16.msra.mxu1 %v4833_v0  ;;  %v4928_v0 = vld [vmem:[#allocation2 + $0x78c] ss:$16 sps:$4 sm:$0xff]  }
 0x1d5   :  { %2605 = vmatpush2.bf16.msra.mxu0 %v4836_v18  ;;  %2565 = vmatprep.subr.bf16.mxu1 %v4841_v41  ;;  %v4923_v18 = vld [vmem:[#allocation2 + $0x780] ss:$16 sps:$4 sm:$0xff]   ;;  %v4926_v41 = vld [vmem:[#allocation2 + $0x788] ss:$16 sps:$4 sm:$0xff]  }
 0x1d6   :  { %2606 = vmatprep.subr.bf16.mxu0 %v4844_v4  ;;  %v4931_v4 = vld [vmem:[#allocation2 + $0x764] ss:$16 sps:$4 sm:$0xff]  }
 0x1d8   :  { %2566 = vmatpush2.bf16.msra.mxu1 %v4839_v43  ;;  %v4934_v43 = vld [vmem:[#allocation2 + $0x76c] ss:$16 sps:$4 sm:$0xff]  }
 0x1d9   :  { %2607 = vmatpush2.bf16.msra.mxu0 %v4842_v12  ;;  %2567 = vmatprep.subr.bf16.mxu1 %v4847_v62  ;;  %v4929_v12 = vld [vmem:[#allocation2 + $0x760] ss:$16 sps:$4 sm:$0xff]   ;;  %v4932_v62 = vld [vmem:[#allocation2 + $0x768] ss:$16 sps:$4 sm:$0xff]  }
 0x1da   :  { %2608 = vmatprep.subr.bf16.mxu0 %v4850_v21  ;;  %v4937_v21 = vld [vmem:[#allocation2 + $0x744] ss:$16 sps:$4 sm:$0xff]  }
 0x1dc   :  { %2568 = vmatpush2.bf16.msra.mxu1 %v4845_v45  ;;  %v4940_v45 = vld [vmem:[#allocation2 + $0x74c] ss:$16 sps:$4 sm:$0xff]  }
 0x1dd   :  { %2609 = vmatpush2.bf16.msra.mxu0 %v4848_v9  ;;  %2569 = vmatprep.subr.bf16.mxu1 %v4853_v26  ;;  %v4935_v9 = vld [vmem:[#allocation2 + $0x740] ss:$16 sps:$4 sm:$0xff]   ;;  %v4938_v26 = vld [vmem:[#allocation2 + $0x748] ss:$16 sps:$4 sm:$0xff]  }
 0x1de   :  { %2610 = vmatprep.subr.bf16.mxu0 %v4856_v38  ;;  %v4943_v38 = vld [vmem:[#allocation2 + $0x724] ss:$16 sps:$4 sm:$0xff]  }
 0x1e0   :  { %2570 = vmatpush2.bf16.msra.mxu1 %v4851_v15  ;;  %v4946_v15 = vld [vmem:[#allocation2 + $0x72c] ss:$16 sps:$4 sm:$0xff]  }
 0x1e1   :  { %2611 = vmatpush2.bf16.msra.mxu0 %v4854_v48  ;;  %3016 = vmatprep.subr.bf16.mxu1 %v4859_v49  ;;  %v4941_v48 = vld [vmem:[#allocation2 + $0x720] ss:$16 sps:$4 sm:$0xff]   ;;  %v4944_v49 = vld [vmem:[#allocation2 + $0x728] ss:$16 sps:$4 sm:$0xff]  }
 0x1e2   :  { %3057 = vmatprep.subr.bf16.mxu0 %v4862_v50  ;;  %v4949_v50 = vld [vmem:[#allocation2 + $0x704] ss:$16 sps:$4 sm:$0xff]  }
 0x1e3   :  { %2572 = vmatmul.mubr.bf16.vlgmr.msra.gmra.mxu1 %v5724_v25 }
 0x1e4   :  { %2613 = vmatmul.mubr.bf16.vlgmr.msra.gmra.mxu0 %v5724_v25  ;;  %3017 = vmatpush1.bf16.msra.mxu1 %v4857_v51  ;;  %v4952_v51 = vld [vmem:[#allocation2 + $0x70c] ss:$16 sps:$4 sm:$0xff]  }
 0x1e5   :  { %3048 = vmatprep.mubr.bf16.mxu1 %v2693_v28  ;;  %3058 = vmatpush1.bf16.msra.mxu0 %v4860_v44  ;;  %v4947_v44 = vld [vmem:[#allocation2 + $0x700] ss:$16 sps:$4 sm:$0xff]  }
 0x1e6   :  { %3089 = vmatprep.mubr.bf16.mxu0 %v2693_v28  ;;  %3018 = vmatprep.subr.bf16.mxu1 %v4865_v31  ;;  %v4950_v31 = vld [vmem:[#allocation2 + $0x708] ss:$16 sps:$4 sm:$0xff]   ;;  %v2692_v28 = vrot.slane %v5724_v25, 4  ;;  %v4964_v25 = vld [vmem:[#allocation4 + $0x164] ss:$8 sps:$4 sm:$0xff]  }
 0x1e7   :  { %3059 = vmatprep.subr.bf16.mxu0 %v4868_v58 }
 0x1e8   :  { %3019 = vmatpush1.bf16.msra.mxu1 %v4863_v40 }
 0x1e9   :  { %3060 = vmatpush1.bf16.msra.mxu0 %v4866_v32  ;;  %3020 = vmatprep.subr.bf16.mxu1 %v4871_v33 }
 0x1ea   :  { %3061 = vmatprep.subr.bf16.mxu0 %v4874_v61 }
 0x1ec   :  { %3021 = vmatpush1.bf16.msra.mxu1 %v4869_v37 }
 0x1ed   :  { %3062 = vmatpush1.bf16.msra.mxu0 %v4872_v6  ;;  %3022 = vmatprep.subr.bf16.mxu1 %v4877_v27 }
 0x1ee   :  { %3063 = vmatprep.subr.bf16.mxu0 %v4880_v35  ;;  %v4953_v35 = vld [vmem:[#allocation4 + $0x70] ss:$8 sps:$4 sm:$0xff]  }
 0x1f0   :  { %3023 = vmatpush1.bf16.msra.mxu1 %v4875_v14  ;;  %v4955_v14 = vld [vmem:[#allocation4 + $0x74] ss:$8 sps:$4 sm:$0xff]  }
 0x1f1   :  { %3064 = vmatpush1.bf16.msra.mxu0 %v4878_v17  ;;  %3024 = vmatprep.subr.bf16.mxu1 %v4883_v59  ;;  %v4956_v17 = vld [vmem:[#allocation4 + $0x170] ss:$8 sps:$4 sm:$0xff]   ;;  %v4958_v59 = vld [vmem:[#allocation4 + $0x174] ss:$8 sps:$4 sm:$0xff]  }
 0x1f2   :  { %3065 = vmatprep.subr.bf16.mxu0 %v4886_v60  ;;  %v4961_v60 = vld [vmem:[#allocation4 + $0x64] ss:$8 sps:$4 sm:$0xff]  }
 0x1f4   :  { %3025 = vmatpush1.bf16.msra.mxu1 %v4881_v42  ;;  %v4959_v42 = vld [vmem:[#allocation4 + $0x60] ss:$8 sps:$4 sm:$0xff]  }
 0x1f5   :  { %3066 = vmatpush1.bf16.msra.mxu0 %v4884_v20  ;;  %3026 = vmatprep.subr.bf16.mxu1 %v4889_v46  ;;  %v4962_v20 = vld [vmem:[#allocation4 + $0x160] ss:$8 sps:$4 sm:$0xff]   ;;  %v4967_v46 = vld [vmem:[#allocation4 + $0x54] ss:$8 sps:$4 sm:$0xff]  }
 0x1f6   :  { %3067 = vmatprep.subr.bf16.mxu0 %v4892_v39  ;;  %v4970_v39 = vld [vmem:[#allocation4 + $0x154] ss:$8 sps:$4 sm:$0xff]  }
 0x1f8   :  { %3027 = vmatpush1.bf16.msra.mxu1 %v4887_v52  ;;  %v4965_v52 = vld [vmem:[#allocation4 + $0x50] ss:$8 sps:$4 sm:$0xff]  }
 0x1f9   :  { %3068 = vmatpush1.bf16.msra.mxu0 %v4890_v53  ;;  %3028 = vmatprep.subr.bf16.mxu1 %v4895_v8  ;;  %v4968_v53 = vld [vmem:[#allocation4 + $0x150] ss:$8 sps:$4 sm:$0xff]   ;;  %v4973_v8 = vld [vmem:[#allocation4 + $0x44] ss:$8 sps:$4 sm:$0xff]  }
 0x1fa   :  { %3069 = vmatprep.subr.bf16.mxu0 %v4898_v29  ;;  %v4976_v29 = vld [vmem:[#allocation4 + $0x144] ss:$8 sps:$4 sm:$0xff]  }
 0x1fc   :  { %3029 = vmatpush1.bf16.msra.mxu1 %v4893_v3  ;;  %v4971_v3 = vld [vmem:[#allocation4 + $0x40] ss:$8 sps:$4 sm:$0xff]  }
 0x1fd   :  { %3070 = vmatpush1.bf16.msra.mxu0 %v4896_v22  ;;  %3030 = vmatprep.subr.bf16.mxu1 %v4901_v54  ;;  %v4974_v22 = vld [vmem:[#allocation4 + $0x140] ss:$8 sps:$4 sm:$0xff]   ;;  %v4979_v54 = vld [vmem:[#allocation4 + $0x34] ss:$8 sps:$4 sm:$0xff]  }
 0x1fe   :  { %3071 = vmatprep.subr.bf16.mxu0 %v4904_v55  ;;  %v4982_v55 = vld [vmem:[#allocation4 + $0x134] ss:$8 sps:$4 sm:$0xff]  }
 0x200   :  { %3031 = vmatpush1.bf16.msra.mxu1 %v4899_v5  ;;  %v4977_v5 = vld [vmem:[#allocation4 + $0x30] ss:$8 sps:$4 sm:$0xff]  }
 0x201   :  { %3072 = vmatpush1.bf16.msra.mxu0 %v4902_v2  ;;  %3032 = vmatprep.subr.bf16.mxu1 %v4907_v10  ;;  %v4980_v2 = vld [vmem:[#allocation4 + $0x130] ss:$8 sps:$4 sm:$0xff]   ;;  %v4985_v10 = vld [vmem:[#allocation4 + $0x24] ss:$8 sps:$4 sm:$0xff]  }
 0x202   :  { %3073 = vmatprep.subr.bf16.mxu0 %v4910_v34  ;;  %v4988_v34 = vld [vmem:[#allocation4 + $0x124] ss:$8 sps:$4 sm:$0xff]  }
 0x204   :  { %3033 = vmatpush2.bf16.msra.mxu1 %v4905_v1  ;;  %v4983_v1 = vld [vmem:[#allocation4 + $0x20] ss:$8 sps:$4 sm:$0xff]  }
 0x205   :  { %3074 = vmatpush2.bf16.msra.mxu0 %v4908_v11  ;;  %3034 = vmatprep.subr.bf16.mxu1 %v4913_v63  ;;  %v4986_v11 = vld [vmem:[#allocation4 + $0x120] ss:$8 sps:$4 sm:$0xff]   ;;  %v4991_v63 = vld [vmem:[#allocation4 + $0x14] ss:$8 sps:$4 sm:$0xff]  }
 0x206   :  { %3075 = vmatprep.subr.bf16.mxu0 %v4916_v7  ;;  %v4994_v7 = vld [vmem:[#allocation4 + $0x114] ss:$8 sps:$4 sm:$0xff]  }
 0x208   :  { %3035 = vmatpush2.bf16.msra.mxu1 %v4911_v13  ;;  %v4989_v13 = vld [vmem:[#allocation4 + $0x10] ss:$8 sps:$4 sm:$0xff]  }
 0x209   :  { %3076 = vmatpush2.bf16.msra.mxu0 %v4914_v36  ;;  %3036 = vmatprep.subr.bf16.mxu1 %v4919_v57  ;;  %v4992_v36 = vld [vmem:[#allocation4 + $0x110] ss:$8 sps:$4 sm:$0xff]   ;;  %v4997_v57 = vld [vmem:[#allocation4 + $0x4] ss:$8 sps:$4 sm:$0xff]  }
 0x20a   :  { %3077 = vmatprep.subr.bf16.mxu0 %v4922_v23  ;;  %v5000_v23 = vld [vmem:[#allocation4 + $0x104] ss:$8 sps:$4 sm:$0xff]  }
 0x20c   :  { %3037 = vmatpush2.bf16.msra.mxu1 %v4917_v19  ;;  %v4995_v19 = vld [vmem:[#allocation4] ss:$8 sps:$4 sm:$0xff]  }
 0x20d   :  { %3078 = vmatpush2.bf16.msra.mxu0 %v4920_v47  ;;  %3038 = vmatprep.subr.bf16.mxu1 %v4925_v30  ;;  %v4998_v47 = vld [vmem:[#allocation4 + $0x100] ss:$8 sps:$4 sm:$0xff]   ;;  %v5003_v30 = vld [vmem:[#allocation4 + $0xf4] ss:$8 sps:$4 sm:$0xff]  }
 0x20e   :  { %3079 = vmatprep.subr.bf16.mxu0 %v4928_v0  ;;  %v5006_v0 = vld [vmem:[#allocation4 + $0x1f4] ss:$8 sps:$4 sm:$0xff]  }
 0x210   :  { %3039 = vmatpush2.bf16.msra.mxu1 %v4923_v18  ;;  %v5001_v18 = vld [vmem:[#allocation4 + $0xf0] ss:$8 sps:$4 sm:$0xff]  }
 0x211   :  { %3080 = vmatpush2.bf16.msra.mxu0 %v4926_v41  ;;  %3040 = vmatprep.subr.bf16.mxu1 %v4931_v4  ;;  %v5004_v41 = vld [vmem:[#allocation4 + $0x1f0] ss:$8 sps:$4 sm:$0xff]   ;;  %v5009_v4 = vld [vmem:[#allocation4 + $0xe4] ss:$8 sps:$4 sm:$0xff]  }
 0x212   :  { %3081 = vmatprep.subr.bf16.mxu0 %v4934_v43  ;;  %v5012_v43 = vld [vmem:[#allocation4 + $0x1e4] ss:$8 sps:$4 sm:$0xff]  }
 0x214   :  { %3041 = vmatpush2.bf16.msra.mxu1 %v4929_v12  ;;  %v5007_v12 = vld [vmem:[#allocation4 + $0xe0] ss:$8 sps:$4 sm:$0xff]  }
 0x215   :  { %3082 = vmatpush2.bf16.msra.mxu0 %v4932_v62  ;;  %3042 = vmatprep.subr.bf16.mxu1 %v4937_v21  ;;  %v5010_v62 = vld [vmem:[#allocation4 + $0x1e0] ss:$8 sps:$4 sm:$0xff]   ;;  %v5015_v21 = vld [vmem:[#allocation4 + $0xd4] ss:$8 sps:$4 sm:$0xff]  }
 0x216   :  { %3083 = vmatprep.subr.bf16.mxu0 %v4940_v45  ;;  %v5018_v45 = vld [vmem:[#allocation4 + $0x1d4] ss:$8 sps:$4 sm:$0xff]  }
 0x218   :  { %3043 = vmatpush2.bf16.msra.mxu1 %v4935_v9  ;;  %v5013_v9 = vld [vmem:[#allocation4 + $0xd0] ss:$8 sps:$4 sm:$0xff]  }
 0x219   :  { %3084 = vmatpush2.bf16.msra.mxu0 %v4938_v26  ;;  %3044 = vmatprep.subr.bf16.mxu1 %v4943_v38  ;;  %v5016_v26 = vld [vmem:[#allocation4 + $0x1d0] ss:$8 sps:$4 sm:$0xff]   ;;  %v5021_v38 = vld [vmem:[#allocation4 + $0xc4] ss:$8 sps:$4 sm:$0xff]  }
 0x21a   :  { %3085 = vmatprep.subr.bf16.mxu0 %v4946_v15  ;;  %v5024_v15 = vld [vmem:[#allocation4 + $0x1c4] ss:$8 sps:$4 sm:$0xff]  }
 0x21c   :  { %3045 = vmatpush2.bf16.msra.mxu1 %v4941_v48  ;;  %v5019_v48 = vld [vmem:[#allocation4 + $0xc0] ss:$8 sps:$4 sm:$0xff]  }
 0x21d   :  { %3086 = vmatpush2.bf16.msra.mxu0 %v4944_v49  ;;  %3046 = vmatprep.subr.bf16.mxu1 %v4949_v50  ;;  %v5022_v49 = vld [vmem:[#allocation4 + $0x1c0] ss:$8 sps:$4 sm:$0xff]   ;;  %v5027_v50 = vld [vmem:[#allocation4 + $0xb4] ss:$8 sps:$4 sm:$0xff]  }
 0x21e   :  { %3087 = vmatprep.subr.bf16.mxu0 %v4952_v51  ;;  %v5030_v51 = vld [vmem:[#allocation4 + $0x1b4] ss:$8 sps:$4 sm:$0xff]  }
 0x220   :  { %3047 = vmatpush2.bf16.msra.mxu1 %v4947_v44  ;;  %v5025_v44 = vld [vmem:[#allocation4 + $0xb0] ss:$8 sps:$4 sm:$0xff]  }
 0x221   :  { %3088 = vmatpush2.bf16.msra.mxu0 %v4950_v31  ;;  %3532 = vmatprep.subr.bf16.mxu1 %v4955_v14  ;;  %v5028_v31 = vld [vmem:[#allocation4 + $0x1b0] ss:$8 sps:$4 sm:$0xff]   ;;  %v5031_v14 = vld [vmem:[#allocation4 + $0xa0] ss:$8 sps:$4 sm:$0xff]  }
 0x222   :  { %3573 = vmatprep.subr.bf16.mxu0 %v4958_v59 }
 0x223   :  { %3049 = vmatmul.mubr.bf16.vlgmr.msra.gmra.mxu1 %v2692_v28  ;;  %v5736_v58 = vpop.f32.mrf.mxu1  ;;  %v5738_v40 = vpop.f32.mrf.mxu0 }
 0x224   :  { %3090 = vmatmul.mubr.bf16.vlgmr.msra.gmra.mxu0 %v2692_v28  ;;  %3533 = vmatpush1.bf16.msra.mxu1 %v4953_v35 }
 0x225   :  { %v5740_v32 = vpop.f32.mrf.mxu1  ;;  %v5742_v33 = vpop.f32.mrf.mxu0  ;;  %3574 = vmatpush1.bf16.msra.mxu0 %v4956_v17  ;;  %3534 = vmatprep.subr.bf16.mxu1 %v4961_v60  ;;  %v5034_v60 = vld [vmem:[#allocation4 + $0x1a0] ss:$8 sps:$4 sm:$0xff]  }
 0x226   :  { %3575 = vmatprep.subr.bf16.mxu0 %v4964_v25 }
 0x227   :  { %v1708_v61 = vpop.f32.mrf.mxu1  ;;  %v1749_v37 = vpop.f32.mrf.mxu0 }
 0x228   :  { %3535 = vmatpush1.bf16.msra.mxu1 %v4959_v42  ;;  %v5033_v37 = vld [vmem:[#allocation4 + $0xa4] ss:$8 sps:$4 sm:$0xff]  }
 0x229   :  { %v1709_v6 = vpop.f32.mrf.mxu1  ;;  %v1750_v27 = vpop.f32.mrf.mxu0  ;;  %3576 = vmatpush1.bf16.msra.mxu0 %v4962_v20  ;;  %3536 = vmatprep.subr.bf16.mxu1 %v4967_v46 }
 0x22a   :  { %3577 = vmatprep.subr.bf16.mxu0 %v4970_v39  ;;  %v5036_v6 = vld [vmem:[#allocation4 + $0x1a4] ss:$8 sps:$4 sm:$0xff]   ;;  %v5039_v39 = vld [vmem:[#allocation4 + $0x94] ss:$8 sps:$4 sm:$0xff]  }
 0x22c   :  { %3537 = vmatpush1.bf16.msra.mxu1 %v4965_v52  ;;  %v5042_v52 = vld [vmem:[#allocation4 + $0x194] ss:$8 sps:$4 sm:$0xff]  }
 0x22d   :  { %3578 = vmatpush1.bf16.msra.mxu0 %v4968_v53  ;;  %3538 = vmatprep.subr.bf16.mxu1 %v4973_v8  ;;  %v5037_v53 = vld [vmem:[#allocation4 + $0x90] ss:$8 sps:$4 sm:$0xff]  }
 0x22e   :  { %3579 = vmatprep.subr.bf16.mxu0 %v4976_v29  ;;  %v5045_v29 = vld [vmem:[#allocation4 + $0x84] ss:$8 sps:$4 sm:$0xff]  }
 0x230   :  { %3539 = vmatpush1.bf16.msra.mxu1 %v4971_v3  ;;  %v5048_v3 = vld [vmem:[#allocation4 + $0x184] ss:$8 sps:$4 sm:$0xff]  }
 0x231   :  { %3580 = vmatpush1.bf16.msra.mxu0 %v4974_v22  ;;  %3540 = vmatprep.subr.bf16.mxu1 %v4979_v54  ;;  %v5043_v22 = vld [vmem:[#allocation4 + $0x80] ss:$8 sps:$4 sm:$0xff]  }
 0x232   :  { %3581 = vmatprep.subr.bf16.mxu0 %v4982_v55 }
 0x234   :  { %3541 = vmatpush1.bf16.msra.mxu1 %v4977_v5 }
 0x235   :  { %3582 = vmatpush1.bf16.msra.mxu0 %v4980_v2  ;;  %3542 = vmatprep.subr.bf16.mxu1 %v4985_v10 }
 0x236   :  { %3583 = vmatprep.subr.bf16.mxu0 %v4988_v34 }
 0x238   :  { %3543 = vmatpush1.bf16.msra.mxu1 %v4983_v1 }
 0x239   :  { %3584 = vmatpush1.bf16.msra.mxu0 %v4986_v11  ;;  %3544 = vmatprep.subr.bf16.mxu1 %v4991_v63 }
 0x23a   :  { %3585 = vmatprep.subr.bf16.mxu0 %v4994_v7 }
 0x23c   :  { %3545 = vmatpush1.bf16.msra.mxu1 %v4989_v13  ;;  %v3102_v13 = vld [vmem:[%s5797_s4] sm:$0xf] }
 0x23d   :  { %3586 = vmatpush1.bf16.msra.mxu0 %v4992_v36  ;;  %3546 = vmatprep.subr.bf16.mxu1 %v4997_v57  ;;  %v3114_v36 = vsub.s32 2, %v5662_v16  ;;  %v3118_v57 = vsub.s32 3, %v5662_v16 }
 0x23e   :  { %3587 = vmatprep.subr.bf16.mxu0 %v5000_v23  ;;  %v3107_v23 = vrot.slane %v3102_v13, %v5681_v24 }
 0x240   :  { %3547 = vmatpush1.bf16.msra.mxu1 %v4995_v19 }
 0x241   :  { %3588 = vmatpush1.bf16.msra.mxu0 %v4998_v47  ;;  %3548 = vmatprep.subr.bf16.mxu1 %v5003_v30  ;;  %v3115_v47 = vrot.slane %v3102_v13, %v3114_v36 }
 0x242   :  { %3589 = vmatprep.subr.bf16.mxu0 %v5006_v0 }
 0x244   :  { %3549 = vmatpush2.bf16.msra.mxu1 %v5001_v18 }
 0x245   :  { %3590 = vmatpush2.bf16.msra.mxu0 %v5004_v41  ;;  %3550 = vmatprep.subr.bf16.mxu1 %v5009_v4  ;;  %v3111_v41 = vrot.slane %v3102_v13, %v5684_v56 }
 0x246   :  { %3591 = vmatprep.subr.bf16.mxu0 %v5012_v43 }
 0x248   :  { %3551 = vmatpush2.bf16.msra.mxu1 %v5007_v12 }
 0x249   :  { %3592 = vmatpush2.bf16.msra.mxu0 %v5010_v62  ;;  %3552 = vmatprep.subr.bf16.mxu1 %v5015_v21  ;;  %v3119_v62 = vrot.slane %v3102_v13, %v3118_v57 }
 0x24a   :  { %3593 = vmatprep.subr.bf16.mxu0 %v5018_v45 }
 0x24c   :  { %3553 = vmatpush2.bf16.msra.mxu1 %v5013_v9 }
 0x24d   :  { %3594 = vmatpush2.bf16.msra.mxu0 %v5016_v26  ;;  %3554 = vmatprep.subr.bf16.mxu1 %v5021_v38 }
 0x24e   :  { %3595 = vmatprep.subr.bf16.mxu0 %v5024_v15 }
 0x250   :  { %3555 = vmatpush2.bf16.msra.mxu1 %v5019_v48 }
 0x251   :  { %3596 = vmatpush2.bf16.msra.mxu0 %v5022_v49  ;;  %3556 = vmatprep.subr.bf16.mxu1 %v5027_v50 }
 0x252   :  { %3597 = vmatprep.subr.bf16.mxu0 %v5030_v51 }
 0x254   :  { %3557 = vmatpush2.bf16.msra.mxu1 %v5025_v44 }
 0x255   :  { %3598 = vmatpush2.bf16.msra.mxu0 %v5028_v31  ;;  %3558 = vmatprep.subr.bf16.mxu1 %v5033_v37 }
 0x256   :  { %3599 = vmatprep.subr.bf16.mxu0 %v5036_v6  ;;  %v5050_v6 = vld [vmem:[#allocation6 + $0x38] sm:$0xff]  }
 0x258   :  { %3559 = vmatpush2.bf16.msra.mxu1 %v5031_v14  ;;  %v5051_v14 = vld [vmem:[#allocation6 + $0x70] sm:$0xff]  }
 0x259   :  { %3600 = vmatpush2.bf16.msra.mxu0 %v5034_v60  ;;  %3560 = vmatprep.subr.bf16.mxu1 %v5039_v39  ;;  %v5053_v60 = vld [vmem:[#allocation6 + $0x68] sm:$0xff]   ;;  %v5058_v39 = vld [vmem:[#allocation6 + $0x18] sm:$0xff]  }
 0x25a   :  { %3601 = vmatprep.subr.bf16.mxu0 %v5042_v52  ;;  %v5059_v52 = vld [vmem:[#allocation6 + $0x50] sm:$0xff]  }
 0x25c   :  { %3561 = vmatpush2.bf16.msra.mxu1 %v5037_v53  ;;  %v5060_v53 = vld [vmem:[#allocation6 + $0x10] sm:$0xff]  }
 0x25d   :  { %3562 = vmatprep.subr.bf16.mxu1 %v5045_v29  ;;  %v5064_v29 = vld [vmem:[#allocation6] sm:$0xff]  }
 0x260   :  { %3563 = vmatpush2.bf16.msra.mxu1 %v5043_v22  ;;  %v5147_v22 = vmov 0.0  }
 0x263   :  { %v2106_v28 = vpop.f32.mrf.mxu1  ;;  %v2147_v61 = vpop.f32.mrf.mxu0 }
 0x264   :  { %v2107_v27 = vadd.f32 %v2106_v28, %v5736_v58  ;;  %v2148_v35 = vadd.f32 %v2147_v61, %v5738_v40  ;;  %v5040_v58 = vld [vmem:[#allocation4 + $0x190] ss:$8 sps:$4 sm:$0xff]  }
 0x265   :  { %v2108_v17 = vpop.f32.mrf.mxu1  ;;  %v2149_v59 = vpop.f32.mrf.mxu0  ;;  %3602 = vmatpush2.bf16.msra.mxu0 %v5040_v58  ;;  %v5061_v58 = vld [vmem:[#allocation6 + $0x48] sm:$0xff]  }
 0x266   :  { %v2109_v25 = vadd.f32 %v2108_v17, %v5740_v32  ;;  %v2150_v42 = vadd.f32 %v2149_v59, %v5742_v33  ;;  %v5046_v32 = vld [vmem:[#allocation4 + $0x180] ss:$8 sps:$4 sm:$0xff]   ;;  %3603 = vmatprep.subr.bf16.mxu0 %v5048_v3  ;;  %v5049_v33 = vld [vmem:[#allocation6 + $0x78] sm:$0xff]   ;;  %v5052_v59 = vld [vmem:[#allocation6 + $0x30] sm:$0xff]  }
 0x267   :  { %v2110_v20 = vpop.f32.mrf.mxu1  ;;  %v2151_v46 = vpop.f32.mrf.mxu0  ;;  %4378 = vmatprep.subr.bf16.mxu1 %v5049_v33  ;;  %v5065_v3 = vld [vmem:[%s5802_s9 + $0x38] sm:$0xff]   ;;  %v5067_v33 = vld [vmem:[%s5802_s9 + $0x28] sm:$0xff]  }
 0x268   :  { %v5056_v20 = vld [vmem:[#allocation6 + $0x20] sm:$0xff]   ;;  %v5057_v46 = vld [vmem:[#allocation6 + $0x58] sm:$0xff]  }
 0x269   :  { %v2111_v8 = vpop.f32.mrf.mxu1  ;;  %v2152_v40 = vpop.f32.mrf.mxu0  ;;  %3604 = vmatpush2.bf16.msra.mxu0 %v5046_v32  ;;  %v5066_v32 = vld [vmem:[%s5802_s9 + $0x30] sm:$0xff]  }
 0x26a   :  { %v5062_v8 = vld [vmem:[#allocation6 + $0x8] sm:$0xff]   ;;  %v5063_v40 = vld [vmem:[#allocation6 + $0x40] sm:$0xff]   ;;  %4409 = vmatprep.subr.bf16.mxu0 %v5147_v22 }
 0x2a3   :  { %v2573_v54 = vpop.f32.mrf.mxu1 }
 0x2a4   :  { %v2621_v55 = vadd.f32 %v2573_v54, %v2107_v27  ;;  %v2614_v5 = vpop.f32.mrf.mxu0  ;;  %v5068_v54 = vld [vmem:[%s5802_s9 + $0x20] sm:$0xff]  }
 0x2a5   :  { %v2623_v2 = vadd.f32 %v2614_v5, %v2148_v35  ;;  %v2575_v10 = vpop.f32.mrf.mxu1  ;;  %v3200_v5 = vld [vmem:[%s5799_s6] sm:$0x3] }
 0x2a6   :  { %v2616_v34 = vpop.f32.mrf.mxu0  ;;  %v2622_v30 = vadd.f32 %v2575_v10, %v2109_v25  ;;  %v5054_v25 = vld [vmem:[#allocation6 + $0x28] sm:$0xff]   ;;  %v3209_v10 = vrot.slane %v3200_v5, %v5684_v56 }
 0x2a7   :  { %v2577_v1 = vpop.f32.mrf.mxu1  ;;  %v2624_v4 = vadd.f32 %v2616_v34, %v2150_v42  ;;  %v5055_v42 = vld [vmem:[#allocation6 + $0x60] sm:$0xff]   ;;  %v5071_v56 = vld [vmem:[%s5802_s9 + $0x8] sm:$0xff]  }
 0x2a8   :  { %v2618_v11 = vpop.f32.mrf.mxu0 }
 0x2a9   :  { %v2578_v63 = vpop.f32.mrf.mxu1 }
 0x2aa   :  { %v2619_v7 = vpop.f32.mrf.mxu0 }
 0x2e3   :  { %v3050_v19 = vpop.f32.mrf.mxu1 }
 0x2e4   :  { %v3098_v0 = vadd.f32 %v3050_v19, %v2621_v55  ;;  %v3091_v18 = vpop.f32.mrf.mxu0  ;;  %v5069_v55 = vld [vmem:[%s5802_s9 + $0x18] sm:$0xff]  }
 0x2e5   :  { %v3100_v43 = vadd.f32 %v3091_v18, %v2623_v2  ;;  %v3052_v12 = vpop.f32.mrf.mxu1  ;;  %v3205_v2 = vrot.slane %v3200_v5, %v5681_v24  ;;  %v5070_v24 = vld [vmem:[%s5802_s9 + $0x10] sm:$0xff]  }
 0x2e6   :  { %v3124_v21 = vadd.f32 %v3107_v23, %v3098_v0  ;;  %v3099_v45 = vadd.f32 %v3052_v12, %v2622_v30  ;;  %v3093_v9 = vpop.f32.mrf.mxu0 }
 0x2e7   :  { %v3126_v26 = vadd.f32 %v3115_v47, %v3100_v43  ;;  %v3101_v38 = vadd.f32 %v3093_v9, %v2624_v4  ;;  %v3054_v15 = vpop.f32.mrf.mxu1  ;;  %v5072_v43 = vld [vmem:[%s5802_s9] sm:$0xff]  }
 0x2e8   :  { %v3125_v16 = vadd.f32 %v3111_v41, %v3099_v45  ;;  %v3095_v48 = vpop.f32.mrf.mxu0  ;;  %v3128_v49 = vmax.f32 %v3124_v21, 0.0 }
 0x2e9   :  { %v3127_v50 = vadd.f32 %v3119_v62, %v3101_v38  ;;  %v3055_v51 = vpop.f32.mrf.mxu1  ;;  %v3130_v44 = vmax.f32 %v3126_v26, 0.0  ;;  %v4352_v62 = vld [vmem:[%s5801_s8] ss:$0 sm:$0xff] }
 0x2ea   :  { %v3129_v31 = vmax.f32 %v3125_v16, 0.0  ;;  %v3096_v28 = vpop.f32.mrf.mxu0  ;;  %v3132_v27 = vpack.c.bf16 %v3128_v49, %v3128_v49  ;;  %v4369_v48 = vld [vmem:[%s5803_s10] ss:$0 sm:$0xff] }
 0x2eb   :  { %v3131_v61 = vmax.f32 %v3127_v50, 0.0  ;;  %v3134_v17 = vpack.c.bf16 %v3130_v44, %v3130_v44 }
 0x2ec   :  { %v3133_v37 = vpack.c.bf16 %v3129_v31, %v3129_v31 }
 0x2ed   :  { %v3135_v35 = vpack.c.bf16 %v3131_v61, %v3131_v61 }
 0x2ee   :  { %3564 = vmatprep.mubr.bf16.mxu1 %v3133_v37 }
 0x2ef   :  { %3605 = vmatprep.mubr.bf16.mxu0 %v3135_v35  ;;  %3565 = vmatmul.mubr.bf16.vlgmr.msra.gmra.mxu1 %v3132_v27 }
 0x2f0   :  { %3606 = vmatmul.mubr.bf16.vlgmr.msra.gmra.mxu0 %v3134_v17  ;;  %4379 = vmatpush3.bf16.msra.mxu1 %v5050_v6 }
 0x2f1   :  { %4380 = vmatprep.subr.bf16.mxu1 %v5051_v14  ;;  %4410 = vmatpush3.bf16.msra.mxu0 %v5065_v3 }
 0x2f2   :  { %4411 = vmatprep.subr.bf16.mxu0 %v5147_v22  ;;  %4425 = vmatprep.mubr.msk.bf16.mxu0 %vm5148_vm2, %v5147_v22 }
 0x2f4   :  { %4381 = vmatpush3.bf16.msra.mxu1 %v5052_v59 }
 0x2f5   :  { %4382 = vmatprep.subr.bf16.mxu1 %v5053_v60  ;;  %4412 = vmatpush3.bf16.msra.mxu0 %v5066_v32 }
 0x2f6   :  { %4413 = vmatprep.subr.bf16.mxu0 %v5147_v22 }
 0x2f8   :  { %4383 = vmatpush3.bf16.msra.mxu1 %v5054_v25 }
 0x2f9   :  { %4384 = vmatprep.subr.bf16.mxu1 %v5055_v42  ;;  %4414 = vmatpush3.bf16.msra.mxu0 %v5067_v33 }
 0x2fa   :  { %4415 = vmatprep.subr.bf16.mxu0 %v5147_v22 }
 0x2fc   :  { %4385 = vmatpush3.bf16.msra.mxu1 %v5056_v20 }
 0x2fd   :  { %4386 = vmatprep.subr.bf16.mxu1 %v5057_v46  ;;  %4416 = vmatpush3.bf16.msra.mxu0 %v5068_v54 }
 0x2fe   :  { %4417 = vmatprep.subr.bf16.mxu0 %v5147_v22 }
 0x300   :  { %4387 = vmatpush3.bf16.msra.mxu1 %v5058_v39 }
 0x301   :  { %4388 = vmatprep.subr.bf16.mxu1 %v5059_v52  ;;  %4418 = vmatpush3.bf16.msra.mxu0 %v5069_v55 }
 0x302   :  { %4419 = vmatprep.subr.bf16.mxu0 %v5147_v22 }
 0x304   :  { %4389 = vmatpush3.bf16.msra.mxu1 %v5060_v53 }
 0x305   :  { %4390 = vmatprep.subr.bf16.mxu1 %v5061_v58  ;;  %4420 = vmatpush3.bf16.msra.mxu0 %v5070_v24 }
 0x306   :  { %4421 = vmatprep.subr.bf16.mxu0 %v5147_v22 }
 0x308   :  { %4391 = vmatpush3.bf16.msra.mxu1 %v5062_v8 }
 0x309   :  { %4392 = vmatprep.subr.bf16.mxu1 %v5063_v40  ;;  %4422 = vmatpush3.bf16.msra.mxu0 %v5071_v56 }
 0x30a   :  { %4423 = vmatprep.subr.bf16.mxu0 %v5147_v22 }
 0x30c   :  { %4393 = vmatpush3.bf16.msra.mxu1 %v5064_v29 }
 0x30d   :  { %4424 = vmatpush3.bf16.msra.mxu0 %v5072_v43 }
 0x3af   :  { %v3566_v34 = vpop.f32.mrf.mxu1 }
 0x3b0   :  { %v3567_v1 = vadd.f32 %v3566_v34, %v3205_v2  ;;  %v3607_v11 = vpop.f32.mrf.mxu0 }
 0x3b1   :  { %v3568_v63 = vpop.f32.mrf.mxu1 }
 0x3b2   :  { %v3608_v7 = vadd.f32 %v3607_v11, %v3567_v1  ;;  %v3569_v13 = vadd.f32 %v3568_v63, %v3209_v10  ;;  %v3609_v36 = vpop.f32.mrf.mxu0 }
 0x3b3   :  { %v3570_v57 = vpop.f32.mrf.mxu1 }
 0x3b4   :  { %v3610_v23 = vadd.f32 %v3609_v36, %v3569_v13  ;;  %v3611_v19 = vpop.f32.mrf.mxu0  ;;  %v3614_v47 = vmax.f32 %v3608_v7, 0.0 }
 0x3b5   :  { %v3571_v30 = vpop.f32.mrf.mxu1 }
 0x3b6   :  { %v3615_v0 = vmax.f32 %v3610_v23, 0.0  ;;  %v3612_v18 = vpop.f32.mrf.mxu0  ;;  %v3616_v4 = vpack.c.bf16 %v3614_v47, %v3614_v47 }
 0x3b8   :  { %v3617_v41 = vpack.c.bf16 %v3615_v0, %v3615_v0 }
 0x3ba   :  { %3785 = vmatprep.mubr.bf16.mxu1 %v3617_v41 }
 0x3bb   :  { %3786 = vmatmul.mubr.bf16.vlgmr.msra.gmra.mxu1 %v3616_v4 }
 0x47b   :  { %v4394_v12 = vpop.f32.mrf.mxu1 }
 0x47d   :  { %v4395_v21 = vpop.f32.mrf.mxu1 }
 0x47e   :  { %v4396_v45 = vadd.f32 %v4395_v21, %v4394_v12 }
 0x47f   :  { %v4397_v9 = vpop.f32.mrf.mxu1 }
 0x480   :  { %v3788_v26 = vadd.f32 %v4396_v45, %v4352_v62 }
 0x481   :  { %v4398_v38 = vpop.f32.mrf.mxu1 }
 0x482   :  { %v3793_v15 = vmax.f32 %v3788_v26, 0.0 }
 0x484   :  { %v3794_v16 = vpack.c.bf16 %v3793_v15, %v3793_v15 }
 0x486   :  { %4426 = vmatmul.mubr.bf16.vlgmr.msra.gmra.mxu0 %v3794_v16 }
 0x546   :  { %v3900_v49 = vpop.f32.mrf.mxu0 }
 0x547   :  { %v3901_v50 = vadd.f32 %v4369_v48, %v3900_v49 }
 0x548   :  { %v4427_v51 = vpop.f32.mrf.mxu0 }
 0x549   :  { %3906 = vst [vmem:[%s5804_s11] sm:$0xff] %v3901_v50 }
 0x54a   :  { %v3903_v44 = vpop.f32.mrf.mxu0 }
 0x54c   :  { %v4428_v31 = vpop.f32.mrf.mxu0 }
 0x54d   :  { %3911 = vsyncpa [#allocation3], 1 }
 0x54e   :  { %3912 = vsyncpa [#allocation5], 1 }

</bundles_post_ra>
